<compile_context>
chip_gen: v7x
topology: tpu7x:2x2x1
jax: 0.10.0
libtpu: 0.0.40
codegen_flags: <defaults>
</compile_context>

<pallas_src>
import functools

import jax
import jax.numpy as jnp
import numpy as np
from jax.experimental import pallas as pl
from jax.experimental.pallas import tpu as pltpu


# ----------------------------------------------------------------------------
# Fused kernel.  One grid step == one (layer, batch_tile, mlp_chunk) triple.
#   slot_ref  : (L,) int32 SMEM      layer -> output slot (scalar prefetch)
#   x_ref     : (TB, S, D) bf16      original input tile (read at layer 0 only)
#   w_in_ref  : (1, D, 3D) bf16      b_in_ref  : (1, 1, 3D) f32
#   w_out_ref : (1, D, D)  bf16      b_out_ref : (1, 1, D)  f32
#   g*/be*    : (1, 1, D)  f32       LayerNorm affine params
#   w_fc_ref  : (1, D, FT) bf16      b_fc_ref  : (1, 1, FT) f32   (FT = 4D/NF)
#   w_pj_ref  : (1, FT, D) bf16      b_pj_ref  : (1, 1, D)  f32
#   feat_ref  : (1, TB, S, D)        per-(consumed)-layer output tile
#   carry_ref : (B, S, D) f32 VMEM   activations carried across layers
#                                    (also the residual-2 / MLP accumulator)
#   qh/kh/vh  : (H, TB, S, dh) bf16  head-major q/k/v scratch
#   mrg_ref   : (TB*S, D) f32        head-merge buffer
#   xn2_ref   : (TB*S, D) bf16       ln_2(x1), reused across MLP chunks
# ----------------------------------------------------------------------------
def fused_transformer_kernel(slot_ref, x_ref,
                             w_in_ref, b_in_ref, w_out_ref, b_out_ref,
                             g1_ref, be1_ref, g2_ref, be2_ref,
                             w_fc_ref, b_fc_ref, w_pj_ref, b_pj_ref,
                             feat_ref,
                             carry_ref, qh_ref, kh_ref, vh_ref, mrg_ref,
                             xn2_ref, *, n_head, tb):
    del slot_ref                                   # only used by the index maps
    l = pl.program_id(0)
    f = pl.program_id(2)
    nf = pl.num_programs(2)
    nb = pl.program_id(1)

    _, S, D = carry_ref.shape
    H = n_head
    dh = D // H
    M = tb * S
    eps = 1e-5

    b0 = pl.multiple_of(nb * tb, tb)
    sl = pl.ds(b0, tb)                             # this step's batch-tile rows

    def layer_norm(z, g_ref, beta_ref):            # fp32 LayerNorm (eps=1e-5)
        mu = jnp.mean(z, axis=-1, keepdims=True)
        var = jnp.mean((z - mu) ** 2, axis=-1, keepdims=True)
        return (z - mu) * jax.lax.rsqrt(var + eps) * g_ref[0] + beta_ref[0]

    # Layer 0: load this batch tile's input into the cross-layer VMEM carry.
    @pl.when(jnp.logical_and(l == 0, f == 0))
    def _():
        carry_ref[sl] = x_ref[...].astype(jnp.float32)

    # ---- attention + residual-1 + ln_2: once per (layer, batch tile) --------
    @pl.when(f == 0)
    def _():
        xr = carry_ref[sl]                                        # (TB, S, D) f32
        x2 = xr.reshape(M, D)
        xn = layer_norm(x2, g1_ref, be1_ref)
        # qkv projection on the full (TB*S, D) row block (MXU-filling M).
        # The 1/sqrt(dh) scale is pre-folded into the q columns of w_in/b_in.
        qkv = jnp.dot(xn.astype(jnp.bfloat16), w_in_ref[0],
                      preferred_element_type=jnp.float32) + b_in_ref[0]
        qkv_b = qkv.astype(jnp.bfloat16)                          # (M, 3D)

        # Head-major relayout via static-slice stores into VMEM scratch
        # (no jnp.stack / concatenate relayout, no explicit k transpose).
        for h in range(H):
            qh_ref[h] = qkv_b[:, 0 * D + h * dh:0 * D + (h + 1) * dh].reshape(tb, S, dh)
            kh_ref[h] = qkv_b[:, 1 * D + h * dh:1 * D + (h + 1) * dh].reshape(tb, S, dh)
            vh_ref[h] = qkv_b[:, 2 * D + h * dh:2 * D + (h + 1) * dh].reshape(tb, S, dh)
        qh = qh_ref[...].reshape(H * tb, S, dh)
        kh = kh_ref[...].reshape(H * tb, S, dh)
        vh = vh_ref[...].reshape(H * tb, S, dh)

        # Batched attention over n = head * batch-in-tile (contraction over dh).
        s = jnp.einsum("nqd,nkd->nqk", qh, kh,
                       preferred_element_type=jnp.float32)        # (H*TB, S, S)
        s = s - jnp.max(s, axis=-1, keepdims=True)
        p = jnp.exp(s)
        p = p * pl.reciprocal(jnp.sum(p, axis=-1, keepdims=True), approx=True)
        av = jnp.einsum("nqk,nkd->nqd", p.astype(jnp.bfloat16), vh,
                        preferred_element_type=jnp.float32)       # (H*TB, S, dh)
        av = av.reshape(H, M, dh)

        # Merge heads via static lane-slice stores, then one (D x D) out proj.
        for h in range(H):
            mrg_ref[:, h * dh:(h + 1) * dh] = av[h]
        a = jnp.dot(mrg_ref[...].astype(jnp.bfloat16), w_out_ref[0],
                    preferred_element_type=jnp.float32) + b_out_ref[0]

        x1 = x2 + a                                               # residual 1 (f32)
        # Residual-2 / MLP accumulator lives in the carry slice itself:
        # seed with x1 + c_proj bias, then accumulate MLP chunks over f.
        carry_ref[sl] = (x1 + b_pj_ref[0]).reshape(tb, S, D)
        xn2_ref[...] = layer_norm(x1, g2_ref, be2_ref).astype(jnp.bfloat16)

    # ---- MLP chunk f: c_fc[:, chunk] -> QuickGELU -> c_proj[chunk, :] -------
    h1 = jnp.dot(xn2_ref[...], w_fc_ref[0],
                 preferred_element_type=jnp.float32) + b_fc_ref[0]  # (M, FT) f32
    h1 = h1 * jax.nn.sigmoid(1.702 * h1)                            # QuickGELU
    h2 = jnp.dot(h1.astype(jnp.bfloat16), w_pj_ref[0],
                 preferred_element_type=jnp.float32)                # (M, D) f32
    carry_ref[sl] = carry_ref[sl] + h2.reshape(tb, S, D)

    # ---- layer output (only for layers the module consumes; slot-compacted) -
    @pl.when(f == nf - 1)
    def _():
        feat_ref[0] = carry_ref[sl].astype(feat_ref.dtype)


# ----------------------------------------------------------------------------
# One-time parameter preparation (per review: stack/cast once, not per call).
# ----------------------------------------------------------------------------
def prepare_params(params, n_head):
    D = params[0]["w_in"].shape[0]
    dh = D // n_head
    scale = 1.0 / float(dh) ** 0.5

    def stack(name):
        return jnp.stack([p[name] for p in params], axis=0)

    # Fold the 1/sqrt(dh) attention scale into the q-projection columns.
    qscale = jnp.concatenate([jnp.full((D,), scale, jnp.float32),
                              jnp.ones((2 * D,), jnp.float32)])
    w_in = stack("w_in") * qscale
    b_in = stack("b_in") * qscale

    return dict(
        w_in=w_in.astype(jnp.bfloat16), b_in=b_in,
        w_out=stack("w_out").astype(jnp.bfloat16), b_out=stack("b_out"),
        g1=stack("g1"), be1=stack("be1"), g2=stack("g2"), be2=stack("be2"),
        w_fc=stack("w_fc").astype(jnp.bfloat16), b_fc=stack("b_fc"),
        w_pj=stack("w_pj").astype(jnp.bfloat16), b_pj=stack("b_pj"),
    )


def _default_batch_tile(B, S):
    # Smallest divisor of B giving the MXU >= ~256 rows per linear matmul.
    for d in range(1, B + 1):
        if B % d == 0 and d * S >= 256:
            return d
    return B


def _default_mlp_tiles(D):
    hidden = 4 * D
    if hidden <= 2048 or hidden % 128 != 0:
        return 1
    for chunk in range(2048, 127, -128):     # largest lane-aligned chunk <= 2048
        if hidden % chunk == 0:
            return hidden // chunk
    return 1


def _vmem_limit_bytes():
    phys = 64 * 1024 * 1024                  # conservative default (v7x)
    try:
        phys = pltpu.get_tpu_info().vmem_capacity_bytes
    except Exception:
        pass
    return int(max(32 * 1024 * 1024,
                   min(100 * 1024 * 1024, phys * 3 // 4)))


# ----------------------------------------------------------------------------
# Wrapper mirroring Transformer.forward.
#   x_sbd: (S, B, D)  ->  (x_out (S, B, D), half_feature [list of (B, S, D)])
# ----------------------------------------------------------------------------
def transformer_forward(x_sbd, stacked, n_head, *, batch_tile=None,
                        mlp_tiles=None):
    w_in = stacked["w_in"]
    L, D, _ = w_in.shape
    S, B, D2 = x_sbd.shape
    assert D2 == D and D % n_head == 0
    dh = D // n_head

    tb = batch_tile if batch_tile is not None else _default_batch_tile(B, S)
    assert B % tb == 0
    nb = B // tb

    hidden = 4 * D
    nf = mlp_tiles if mlp_tiles is not None else _default_mlp_tiles(D)
    if nf > 1 and (hidden % nf != 0 or (hidden // nf) % 128 != 0):
        nf = 1                                   # chunk must be lane-aligned
    ft = hidden // nf

    # Layers whose outputs the module actually consumes: final x + half_feature.
    needed = sorted({L - 1} | {i for i in range(L)
                               if i % 2 == 1 and i >= L // 2})
    slot_of = {layer: s for s, layer in enumerate(needed)}
    slot_map_host, nxt = [], 0
    for i in range(L):
        while needed[nxt] < i:
            nxt += 1
        slot_map_host.append(nxt)
    slot_map = jnp.asarray(slot_map_host, dtype=jnp.int32)

    # Kernel layout: (B, S, D); bf16 input (immediately promoted to f32 carry).
    xb = jnp.transpose(x_sbd, (1, 0, 2)).astype(jnp.bfloat16)

    lay = lambda l, b, f, slot: (l, 0, 0)        # one layer's block per step
    in_specs = [
        # original input: fetch block b only at layer 0 (constant afterwards).
        pl.BlockSpec((tb, S, D),
                     lambda l, b, f, slot: (jnp.where(l == 0, b, 0), 0, 0)),
        pl.BlockSpec((1, D, 3 * D), lay),        # w_in
        pl.BlockSpec((1, 1, 3 * D), lay),        # b_in
        pl.BlockSpec((1, D, D), lay),            # w_out
        pl.BlockSpec((1, 1, D), lay),            # b_out
        pl.BlockSpec((1, 1, D), lay),            # g1
        pl.BlockSpec((1, 1, D), lay),            # be1
        pl.BlockSpec((1, 1, D), lay),            # g2
        pl.BlockSpec((1, 1, D), lay),            # be2
        pl.BlockSpec((1, D, ft), lambda l, b, f, slot: (l, 0, f)),   # w_fc chunk
        pl.BlockSpec((1, 1, ft), lambda l, b, f, slot: (l, 0, f)),   # b_fc chunk
        pl.BlockSpec((1, ft, D), lambda l, b, f, slot: (l, f, 0)),   # w_pj chunk
        pl.BlockSpec((1, 1, D), lay),            # b_pj
    ]
    out_spec = pl.BlockSpec((1, tb, S, D),
                            lambda l, b, f, slot: (slot[l], b, 0, 0))

    feats = pl.pallas_call(
        functools.partial(fused_transformer_kernel, n_head=n_head, tb=tb),
        out_shape=jax.ShapeDtypeStruct((len(needed), B, S, D), x_sbd.dtype),
        grid_spec=pltpu.PrefetchScalarGridSpec(
            num_scalar_prefetch=1,
            grid=(L, nb, nf),                    # layer outer, mlp chunk inner
            in_specs=in_specs,
            out_specs=out_spec,
            scratch_shapes=[
                pltpu.VMEM((B, S, D), jnp.float32),              # layer carry / acc
                pltpu.VMEM((n_head, tb, S, dh), jnp.bfloat16),   # q (head-major)
                pltpu.VMEM((n_head, tb, S, dh), jnp.bfloat16),   # k
                pltpu.VMEM((n_head, tb, S, dh), jnp.bfloat16),   # v
                pltpu.VMEM((tb * S, D), jnp.float32),            # head merge
                pltpu.VMEM((tb * S, D), jnp.bfloat16),           # ln_2(x1)
            ],
        ),
        compiler_params=pltpu.CompilerParams(
            # On v7x the "parallel" batch-tile axis megacore-shards; each core
            # keeps a fixed batch-tile range across all (sequential) layer
            # steps, so its private carry scratch only sees rows it wrote.
            dimension_semantics=("arbitrary", "parallel", "arbitrary"),
            vmem_limit_bytes=_vmem_limit_bytes(),
        ),
    )(slot_map, xb, stacked["w_in"], stacked["b_in"], stacked["w_out"],
      stacked["b_out"], stacked["g1"], stacked["be1"], stacked["g2"],
      stacked["be2"], stacked["w_fc"], stacked["b_fc"], stacked["w_pj"],
      stacked["b_pj"])

    # i == L // 2: x = x.detach()  -> autograd-only, no forward-value effect.
    x_out = jnp.transpose(feats[slot_of[L - 1]], (1, 0, 2))       # (S, B, D)
    half_feature = [feats[slot_of[i]] for i in range(L)
                    if i % 2 == 1 and i >= L // 2]                # (B, S, D) each
    return x_out, half_feature


# ----------------------------------------------------------------------------
# Pure-JAX f32 reference (same math) for correctness checking.
# ----------------------------------------------------------------------------
def resblock_ref(xb, p, n_head):
    B, S, D = xb.shape
    dh = D // n_head
    eps = 1e-5

    def ln(z, g, b):
        mu = jnp.mean(z, -1, keepdims=True)
        var = jnp.mean((z - mu) ** 2, -1, keepdims=True)
        return (z - mu) / jnp.sqrt(var + eps) * g[0] + b[0]

    xn = ln(xb, p["g1"], p["be1"])
    qkv = xn @ p["w_in"] + p["b_in"][0]
    q, k, v = qkv[..., :D], qkv[..., D:2 * D], qkv[..., 2 * D:]
    q = q.reshape(B, S, n_head, dh).transpose(0, 2, 1, 3) * (dh ** -0.5)
    k = k.reshape(B, S, n_head, dh).transpose(0, 2, 1, 3)
    v = v.reshape(B, S, n_head, dh).transpose(0, 2, 1, 3)
    s = jnp.einsum("bhqd,bhkd->bhqk", q, k)
    pso = jax.nn.softmax(s, axis=-1)
    a = jnp.einsum("bhqk,bhkd->bhqd", pso, v).transpose(0, 2, 1, 3).reshape(B, S, D)
    a = a @ p["w_out"] + p["b_out"][0]
    x1 = xb + a
    xn2 = ln(x1, p["g2"], p["be2"])
    h1 = xn2 @ p["w_fc"] + p["b_fc"][0]
    h1 = h1 * jax.nn.sigmoid(1.702 * h1)
    h2 = h1 @ p["w_pj"] + p["b_pj"][0]
    return x1 + h2


# ----------------------------------------------------------------------------
# Deterministic parameter construction.
# ----------------------------------------------------------------------------
def init_params(key, width, layers):
    params = []
    for i in range(layers):
        k = jax.random.fold_in(key, i)
        ks = jax.random.split(k, 8)
        D = width
        p = {
            "w_in":  0.02 * jax.random.normal(ks[0], (D, 3 * D), jnp.float32),
            "b_in":  0.02 * jax.random.normal(ks[1], (1, 3 * D), jnp.float32),
            "w_out": 0.02 * jax.random.normal(ks[2], (D, D), jnp.float32),
            "b_out": 0.02 * jax.random.normal(ks[3], (1, D), jnp.float32),
            "g1":  jnp.ones((1, D), jnp.float32),
            "be1": jnp.zeros((1, D), jnp.float32),
            "g2":  jnp.ones((1, D), jnp.float32),
            "be2": jnp.zeros((1, D), jnp.float32),
            "w_fc":  0.02 * jax.random.normal(ks[4], (D, 4 * D), jnp.float32),
            "b_fc":  0.02 * jax.random.normal(ks[5], (1, 4 * D), jnp.float32),
            "w_pj":  0.02 * jax.random.normal(ks[6], (4 * D, D), jnp.float32),
            "b_pj":  0.02 * jax.random.normal(ks[7], (1, D), jnp.float32),
        }
        params.append(p)
    return params


if __name__ == "__main__":
    WIDTH, LAYERS, HEADS = 64, 5, 4
    SEQ, BATCH = 8, 4

    key = jax.random.PRNGKey(0)
    kx, kp = jax.random.split(key)
    x = jax.random.normal(kx, (SEQ, BATCH, WIDTH), jnp.float32)   # (S, B, D)
    params = init_params(kp, WIDTH, LAYERS)
    stacked = prepare_params(params, HEADS)       # one-time stacking / bf16 cast

    # Pure-JAX f32 reference.
    xb_ref = jnp.transpose(x, (1, 0, 2))
    ref_half = []
    for i in range(LAYERS):
        xb_ref = resblock_ref(xb_ref, params[i], HEADS)
        if i % 2 == 1 and i >= LAYERS // 2:
            ref_half.append(xb_ref)
    ref_out = jnp.transpose(xb_ref, (1, 0, 2))

    # Run 1: explicit batch tile + MLP-weight tiling (exercises all grid axes).
    # Run 2: default tiling (single batch tile, untiled MLP weights).
    for kwargs in ({"batch_tile": 2, "mlp_tiles": 2}, {}):
        out, half_feature = transformer_forward(x, stacked, HEADS, **kwargs)
        out = jax.block_until_ready(out)
        half_feature = [jax.block_until_ready(h) for h in half_feature]

        # Kernel uses bf16 MXU operands + approx reciprocal: compare at ~2e-2.
        np.testing.assert_allclose(np.asarray(out), np.asarray(ref_out),
                                   rtol=2e-2, atol=2e-2)
        assert len(half_feature) == len(ref_half) == 1
        for got, want in zip(half_feature, ref_half):
            assert got.shape == (BATCH, SEQ, WIDTH)
            np.testing.assert_allclose(np.asarray(got), np.asarray(want),
                                       rtol=2e-2, atol=2e-2)

    print("KERNEL_OK")
</pallas_src>

<mosaic_0001>
module attributes {stable_mosaic.version = 11 : i64} {
  func.func @fused_transformer_kernel(%arg0: i32, %arg1: i32, %arg2: i32, %arg3: memref<5xi32, #tpu.memory_space<smem>>, %arg4: memref<2x8x64xbf16, #tpu.memory_space<vmem>>, %arg5: memref<1x64x192xbf16, #tpu.memory_space<vmem>>, %arg6: memref<1x1x192xf32, #tpu.memory_space<vmem>>, %arg7: memref<1x64x64xbf16, #tpu.memory_space<vmem>>, %arg8: memref<1x1x64xf32, #tpu.memory_space<vmem>>, %arg9: memref<1x1x64xf32, #tpu.memory_space<vmem>>, %arg10: memref<1x1x64xf32, #tpu.memory_space<vmem>>, %arg11: memref<1x1x64xf32, #tpu.memory_space<vmem>>, %arg12: memref<1x1x64xf32, #tpu.memory_space<vmem>>, %arg13: memref<1x64x128xbf16, #tpu.memory_space<vmem>>, %arg14: memref<1x1x128xf32, #tpu.memory_space<vmem>>, %arg15: memref<1x128x64xbf16, #tpu.memory_space<vmem>>, %arg16: memref<1x1x64xf32, #tpu.memory_space<vmem>>, %arg17: memref<1x2x8x64xf32, #tpu.memory_space<vmem>>, %arg18: memref<4x8x64xf32, #tpu.memory_space<vmem>>, %arg19: memref<4x2x8x16xbf16, #tpu.memory_space<vmem>>, %arg20: memref<4x2x8x16xbf16, #tpu.memory_space<vmem>>, %arg21: memref<4x2x8x16xbf16, #tpu.memory_space<vmem>>, %arg22: memref<16x64xf32, #tpu.memory_space<vmem>>, %arg23: memref<16x64xbf16, #tpu.memory_space<vmem>>) attributes {dimension_semantics = [#tpu.dimension_semantics<arbitrary>, #tpu.dimension_semantics<parallel>, #tpu.dimension_semantics<arbitrary>], iteration_bounds = array<i64: 5, 2, 2>, scalar_prefetch = 1 : i64, scratch_operands = 6 : i64, tpu.core_type = #tpu.core_type<tc>, window_params = [{transform_indices = @transform_0, window_bounds = array<i64: 2, 8, 64>}, {transform_indices = @transform_1, window_bounds = array<i64: 1, 64, 192>}, {transform_indices = @transform_2, window_bounds = array<i64: 1, 1, 192>}, {transform_indices = @transform_3, window_bounds = array<i64: 1, 64, 64>}, {transform_indices = @transform_4, window_bounds = array<i64: 1, 1, 64>}, {transform_indices = @transform_5, window_bounds = array<i64: 1, 1, 64>}, {transform_indices = @transform_6, window_bounds = array<i64: 1, 1, 64>}, {transform_indices = @transform_7, window_bounds = array<i64: 1, 1, 64>}, {transform_indices = @transform_8, window_bounds = array<i64: 1, 1, 64>}, {transform_indices = @transform_9, window_bounds = array<i64: 1, 64, 128>}, {transform_indices = @transform_10, window_bounds = array<i64: 1, 1, 128>}, {transform_indices = @transform_11, window_bounds = array<i64: 1, 128, 64>}, {transform_indices = @transform_12, window_bounds = array<i64: 1, 1, 64>}, {transform_indices = @transform_13, window_bounds = array<i64: 1, 2, 8, 64>}]} {
    %c2_i32 = arith.constant 2 : i32
    %0 = arith.muli %arg1, %c2_i32 : i32
    %1 = tpu.assume_multiple %0, 2 : i32
    %c0_i32 = arith.constant 0 : i32
    %2 = arith.cmpi eq, %arg0, %c0_i32 : i32
    %c0_i32_0 = arith.constant 0 : i32
    %3 = arith.cmpi eq, %arg2, %c0_i32_0 : i32
    %4 = arith.andi %2, %3 : i1
    %5 = arith.extui %4 : i1 to i32
    %c0_i32_1 = arith.constant 0 : i32
    %6 = arith.cmpi ne, %5, %c0_i32_1 : i32
    scf.if %6 {
      %c0_22 = arith.constant 0 : index
      %c0_23 = arith.constant 0 : index
      %c0_24 = arith.constant 0 : index
      %39 = vector.load %arg4[%c0_22, %c0_23, %c0_24] : memref<2x8x64xbf16, #tpu.memory_space<vmem>>, vector<2x8x64xbf16>
      %40 = arith.extf %39 : vector<2x8x64xbf16> to vector<2x8x64xf32>
      %41 = arith.index_cast %1 : i32 to index
      %c0_25 = arith.constant 0 : index
      %c0_26 = arith.constant 0 : index
      %42 = vector.load %arg18[%41, %c0_25, %c0_26] : memref<4x8x64xf32, #tpu.memory_space<vmem>>, vector<2x8x64xf32>
      tpu.vector_store %arg18[%41, %c0_25, %c0_26], %40 {strides = array<i32>} : memref<4x8x64xf32, #tpu.memory_space<vmem>>, vector<2x8x64xf32>,
    } else {
    }
    %c0_i32_2 = arith.constant 0 : i32
    %7 = arith.cmpi eq, %arg2, %c0_i32_2 : i32
    %8 = arith.extui %7 : i1 to i32
    %c0_i32_3 = arith.constant 0 : i32
    %9 = arith.cmpi ne, %8, %c0_i32_3 : i32
    scf.if %9 {
      %39 = arith.index_cast %1 : i32 to index
      %c0_22 = arith.constant 0 : index
      %c0_23 = arith.constant 0 : index
      %40 = vector.load %arg18[%39, %c0_22, %c0_23] : memref<4x8x64xf32, #tpu.memory_space<vmem>>, vector<2x8x64xf32>
      %41 = vector.shape_cast %40 : vector<2x8x64xf32> to vector<16x64xf32>
      %cst_24 = arith.constant dense<0.000000e+00> : vector<16xf32>
      %42 = vector.multi_reduction <add>, %41, %cst_24 [1] : vector<16x64xf32> to vector<16xf32>
      %43 = vector.shape_cast %42 : vector<16xf32> to vector<16x1xf32>
      %cst_25 = arith.constant 6.400000e+01 : f32
      %44 = vector.broadcast %cst_25 : f32 to vector<16x1xf32>
      %45 = arith.divf %43, %44 : vector<16x1xf32>
      %46 = vector.broadcast %45 : vector<16x1xf32> to vector<16x64xf32>
      %47 = arith.subf %41, %46 : vector<16x64xf32>
      %48 = arith.mulf %47, %47 : vector<16x64xf32>
      %cst_26 = arith.constant dense<0.000000e+00> : vector<16xf32>
      %49 = vector.multi_reduction <add>, %48, %cst_26 [1] : vector<16x64xf32> to vector<16xf32>
      %50 = vector.shape_cast %49 : vector<16xf32> to vector<16x1xf32>
      %cst_27 = arith.constant 6.400000e+01 : f32
      %51 = vector.broadcast %cst_27 : f32 to vector<16x1xf32>
      %52 = arith.divf %50, %51 : vector<16x1xf32>
      %53 = vector.broadcast %45 : vector<16x1xf32> to vector<16x64xf32>
      %54 = arith.subf %41, %53 : vector<16x64xf32>
      %cst_28 = arith.constant 9.99999974E-6 : f32
      %55 = vector.broadcast %cst_28 : f32 to vector<16x1xf32>
      %56 = arith.addf %52, %55 : vector<16x1xf32>
      %57 = math.rsqrt %56 : vector<16x1xf32>
      %58 = vector.broadcast %57 : vector<16x1xf32> to vector<16x64xf32>
      %59 = arith.mulf %54, %58 : vector<16x64xf32>
      %c0_29 = arith.constant 0 : index
      %c0_30 = arith.constant 0 : index
      %c0_31 = arith.constant 0 : index
      %60 = vector.load %arg9[%c0_29, %c0_30, %c0_31] : memref<1x1x64xf32, #tpu.memory_space<vmem>>, vector<1x1x64xf32>
      %61 = vector.shape_cast %60 : vector<1x1x64xf32> to vector<1x64xf32>
      %62 = vector.broadcast %61 : vector<1x64xf32> to vector<16x64xf32>
      %63 = arith.mulf %59, %62 : vector<16x64xf32>
      %c0_32 = arith.constant 0 : index
      %c0_33 = arith.constant 0 : index
      %c0_34 = arith.constant 0 : index
      %64 = vector.load %arg10[%c0_32, %c0_33, %c0_34] : memref<1x1x64xf32, #tpu.memory_space<vmem>>, vector<1x1x64xf32>
      %65 = vector.shape_cast %64 : vector<1x1x64xf32> to vector<1x64xf32>
      %66 = vector.broadcast %65 : vector<1x64xf32> to vector<16x64xf32>
      %67 = arith.addf %63, %66 : vector<16x64xf32>
      %68 = arith.truncf %67 : vector<16x64xf32> to vector<16x64xbf16>
      %c0_35 = arith.constant 0 : index
      %c0_36 = arith.constant 0 : index
      %c0_37 = arith.constant 0 : index
      %69 = vector.load %arg5[%c0_35, %c0_36, %c0_37] : memref<1x64x192xbf16, #tpu.memory_space<vmem>>, vector<1x64x192xbf16>
      %70 = vector.shape_cast %69 : vector<1x64x192xbf16> to vector<64x192xbf16>
      %cst_38 = arith.constant dense<0.000000e+00> : vector<16x192xf32>
      %71 = tpu.matmul %68, %70, %cst_38 {dimension_numbers = #tpu.dot_dimension_numbers<[1], [0], [0], [1], [0, 0, 1, 1], [], []>} : vector<16x64xbf16>, vector<64x192xbf16>, vector<16x192xf32> -> vector<16x192xf32>
      %c0_39 = arith.constant 0 : index
      %c0_40 = arith.constant 0 : index
      %c0_41 = arith.constant 0 : index
      %72 = vector.load %arg6[%c0_39, %c0_40, %c0_41] : memref<1x1x192xf32, #tpu.memory_space<vmem>>, vector<1x1x192xf32>
      %73 = vector.shape_cast %72 : vector<1x1x192xf32> to vector<1x192xf32>
      %74 = vector.broadcast %73 : vector<1x192xf32> to vector<16x192xf32>
      %75 = arith.addf %71, %74 : vector<16x192xf32>
      %76 = arith.truncf %75 : vector<16x192xf32> to vector<16x192xbf16>
      %77 = vector.extract_strided_slice %76 {offsets = [0, 0], sizes = [16, 16], strides = [1, 1]} : vector<16x192xbf16> to vector<16x16xbf16>
      %78 = vector.shape_cast %77 : vector<16x16xbf16> to vector<2x8x16xbf16>
      %c0_42 = arith.constant 0 : index
      %c0_43 = arith.constant 0 : index
      %c0_44 = arith.constant 0 : index
      %c0_45 = arith.constant 0 : index
      %79 = vector.load %arg19[%c0_42, %c0_43, %c0_44, %c0_45] : memref<4x2x8x16xbf16, #tpu.memory_space<vmem>>, vector<1x2x8x16xbf16>
      %80 = vector.shape_cast %79 : vector<1x2x8x16xbf16> to vector<2x8x16xbf16>
      %81 = vector.shape_cast %78 : vector<2x8x16xbf16> to vector<1x2x8x16xbf16>
      tpu.vector_store %arg19[%c0_42, %c0_43, %c0_44, %c0_45], %81 {strides = array<i32>} : memref<4x2x8x16xbf16, #tpu.memory_space<vmem>>, vector<1x2x8x16xbf16>,
      %82 = vector.extract_strided_slice %76 {offsets = [0, 64], sizes = [16, 16], strides = [1, 1]} : vector<16x192xbf16> to vector<16x16xbf16>
      %83 = vector.shape_cast %82 : vector<16x16xbf16> to vector<2x8x16xbf16>
      %c0_46 = arith.constant 0 : index
      %c0_47 = arith.constant 0 : index
      %c0_48 = arith.constant 0 : index
      %c0_49 = arith.constant 0 : index
      %84 = vector.load %arg20[%c0_46, %c0_47, %c0_48, %c0_49] : memref<4x2x8x16xbf16, #tpu.memory_space<vmem>>, vector<1x2x8x16xbf16>
      %85 = vector.shape_cast %84 : vector<1x2x8x16xbf16> to vector<2x8x16xbf16>
      %86 = vector.shape_cast %83 : vector<2x8x16xbf16> to vector<1x2x8x16xbf16>
      tpu.vector_store %arg20[%c0_46, %c0_47, %c0_48, %c0_49], %86 {strides = array<i32>} : memref<4x2x8x16xbf16, #tpu.memory_space<vmem>>, vector<1x2x8x16xbf16>,
      %87 = vector.extract_strided_slice %76 {offsets = [0, 128], sizes = [16, 16], strides = [1, 1]} : vector<16x192xbf16> to vector<16x16xbf16>
      %88 = vector.shape_cast %87 : vector<16x16xbf16> to vector<2x8x16xbf16>
      %c0_50 = arith.constant 0 : index
      %c0_51 = arith.constant 0 : index
      %c0_52 = arith.constant 0 : index
      %c0_53 = arith.constant 0 : index
      %89 = vector.load %arg21[%c0_50, %c0_51, %c0_52, %c0_53] : memref<4x2x8x16xbf16, #tpu.memory_space<vmem>>, vector<1x2x8x16xbf16>
      %90 = vector.shape_cast %89 : vector<1x2x8x16xbf16> to vector<2x8x16xbf16>
      %91 = vector.shape_cast %88 : vector<2x8x16xbf16> to vector<1x2x8x16xbf16>
      tpu.vector_store %arg21[%c0_50, %c0_51, %c0_52, %c0_53], %91 {strides = array<i32>} : memref<4x2x8x16xbf16, #tpu.memory_space<vmem>>, vector<1x2x8x16xbf16>,
      %92 = vector.extract_strided_slice %76 {offsets = [0, 16], sizes = [16, 16], strides = [1, 1]} : vector<16x192xbf16> to vector<16x16xbf16>
      %93 = vector.shape_cast %92 : vector<16x16xbf16> to vector<2x8x16xbf16>
      %c1 = arith.constant 1 : index
      %c0_54 = arith.constant 0 : index
      %c0_55 = arith.constant 0 : index
      %c0_56 = arith.constant 0 : index
      %94 = vector.load %arg19[%c1, %c0_54, %c0_55, %c0_56] : memref<4x2x8x16xbf16, #tpu.memory_space<vmem>>, vector<1x2x8x16xbf16>
      %95 = vector.shape_cast %94 : vector<1x2x8x16xbf16> to vector<2x8x16xbf16>
      %96 = vector.shape_cast %93 : vector<2x8x16xbf16> to vector<1x2x8x16xbf16>
      tpu.vector_store %arg19[%c1, %c0_54, %c0_55, %c0_56], %96 {strides = array<i32>} : memref<4x2x8x16xbf16, #tpu.memory_space<vmem>>, vector<1x2x8x16xbf16>,
      %97 = vector.extract_strided_slice %76 {offsets = [0, 80], sizes = [16, 16], strides = [1, 1]} : vector<16x192xbf16> to vector<16x16xbf16>
      %98 = vector.shape_cast %97 : vector<16x16xbf16> to vector<2x8x16xbf16>
      %c1_57 = arith.constant 1 : index
      %c0_58 = arith.constant 0 : index
      %c0_59 = arith.constant 0 : index
      %c0_60 = arith.constant 0 : index
      %99 = vector.load %arg20[%c1_57, %c0_58, %c0_59, %c0_60] : memref<4x2x8x16xbf16, #tpu.memory_space<vmem>>, vector<1x2x8x16xbf16>
      %100 = vector.shape_cast %99 : vector<1x2x8x16xbf16> to vector<2x8x16xbf16>
      %101 = vector.shape_cast %98 : vector<2x8x16xbf16> to vector<1x2x8x16xbf16>
      tpu.vector_store %arg20[%c1_57, %c0_58, %c0_59, %c0_60], %101 {strides = array<i32>} : memref<4x2x8x16xbf16, #tpu.memory_space<vmem>>, vector<1x2x8x16xbf16>,
      %102 = vector.extract_strided_slice %76 {offsets = [0, 144], sizes = [16, 16], strides = [1, 1]} : vector<16x192xbf16> to vector<16x16xbf16>
      %103 = vector.shape_cast %102 : vector<16x16xbf16> to vector<2x8x16xbf16>
      %c1_61 = arith.constant 1 : index
      %c0_62 = arith.constant 0 : index
      %c0_63 = arith.constant 0 : index
      %c0_64 = arith.constant 0 : index
      %104 = vector.load %arg21[%c1_61, %c0_62, %c0_63, %c0_64] : memref<4x2x8x16xbf16, #tpu.memory_space<vmem>>, vector<1x2x8x16xbf16>
      %105 = vector.shape_cast %104 : vector<1x2x8x16xbf16> to vector<2x8x16xbf16>
      %106 = vector.shape_cast %103 : vector<2x8x16xbf16> to vector<1x2x8x16xbf16>
      tpu.vector_store %arg21[%c1_61, %c0_62, %c0_63, %c0_64], %106 {strides = array<i32>} : memref<4x2x8x16xbf16, #tpu.memory_space<vmem>>, vector<1x2x8x16xbf16>,
      %107 = vector.extract_strided_slice %76 {offsets = [0, 32], sizes = [16, 16], strides = [1, 1]} : vector<16x192xbf16> to vector<16x16xbf16>
      %108 = vector.shape_cast %107 : vector<16x16xbf16> to vector<2x8x16xbf16>
      %c2 = arith.constant 2 : index
      %c0_65 = arith.constant 0 : index
      %c0_66 = arith.constant 0 : index
      %c0_67 = arith.constant 0 : index
      %109 = vector.load %arg19[%c2, %c0_65, %c0_66, %c0_67] : memref<4x2x8x16xbf16, #tpu.memory_space<vmem>>, vector<1x2x8x16xbf16>
      %110 = vector.shape_cast %109 : vector<1x2x8x16xbf16> to vector<2x8x16xbf16>
      %111 = vector.shape_cast %108 : vector<2x8x16xbf16> to vector<1x2x8x16xbf16>
      tpu.vector_store %arg19[%c2, %c0_65, %c0_66, %c0_67], %111 {strides = array<i32>} : memref<4x2x8x16xbf16, #tpu.memory_space<vmem>>, vector<1x2x8x16xbf16>,
      %112 = vector.extract_strided_slice %76 {offsets = [0, 96], sizes = [16, 16], strides = [1, 1]} : vector<16x192xbf16> to vector<16x16xbf16>
      %113 = vector.shape_cast %112 : vector<16x16xbf16> to vector<2x8x16xbf16>
      %c2_68 = arith.constant 2 : index
      %c0_69 = arith.constant 0 : index
      %c0_70 = arith.constant 0 : index
      %c0_71 = arith.constant 0 : index
      %114 = vector.load %arg20[%c2_68, %c0_69, %c0_70, %c0_71] : memref<4x2x8x16xbf16, #tpu.memory_space<vmem>>, vector<1x2x8x16xbf16>
      %115 = vector.shape_cast %114 : vector<1x2x8x16xbf16> to vector<2x8x16xbf16>
      %116 = vector.shape_cast %113 : vector<2x8x16xbf16> to vector<1x2x8x16xbf16>
      tpu.vector_store %arg20[%c2_68, %c0_69, %c0_70, %c0_71], %116 {strides = array<i32>} : memref<4x2x8x16xbf16, #tpu.memory_space<vmem>>, vector<1x2x8x16xbf16>,
      %117 = vector.extract_strided_slice %76 {offsets = [0, 160], sizes = [16, 16], strides = [1, 1]} : vector<16x192xbf16> to vector<16x16xbf16>
      %118 = vector.shape_cast %117 : vector<16x16xbf16> to vector<2x8x16xbf16>
      %c2_72 = arith.constant 2 : index
      %c0_73 = arith.constant 0 : index
      %c0_74 = arith.constant 0 : index
      %c0_75 = arith.constant 0 : index
      %119 = vector.load %arg21[%c2_72, %c0_73, %c0_74, %c0_75] : memref<4x2x8x16xbf16, #tpu.memory_space<vmem>>, vector<1x2x8x16xbf16>
      %120 = vector.shape_cast %119 : vector<1x2x8x16xbf16> to vector<2x8x16xbf16>
      %121 = vector.shape_cast %118 : vector<2x8x16xbf16> to vector<1x2x8x16xbf16>
      tpu.vector_store %arg21[%c2_72, %c0_73, %c0_74, %c0_75], %121 {strides = array<i32>} : memref<4x2x8x16xbf16, #tpu.memory_space<vmem>>, vector<1x2x8x16xbf16>,
      %122 = vector.extract_strided_slice %76 {offsets = [0, 48], sizes = [16, 16], strides = [1, 1]} : vector<16x192xbf16> to vector<16x16xbf16>
      %123 = vector.shape_cast %122 : vector<16x16xbf16> to vector<2x8x16xbf16>
      %c3 = arith.constant 3 : index
      %c0_76 = arith.constant 0 : index
      %c0_77 = arith.constant 0 : index
      %c0_78 = arith.constant 0 : index
      %124 = vector.load %arg19[%c3, %c0_76, %c0_77, %c0_78] : memref<4x2x8x16xbf16, #tpu.memory_space<vmem>>, vector<1x2x8x16xbf16>
      %125 = vector.shape_cast %124 : vector<1x2x8x16xbf16> to vector<2x8x16xbf16>
      %126 = vector.shape_cast %123 : vector<2x8x16xbf16> to vector<1x2x8x16xbf16>
      tpu.vector_store %arg19[%c3, %c0_76, %c0_77, %c0_78], %126 {strides = array<i32>} : memref<4x2x8x16xbf16, #tpu.memory_space<vmem>>, vector<1x2x8x16xbf16>,
      %127 = vector.extract_strided_slice %76 {offsets = [0, 112], sizes = [16, 16], strides = [1, 1]} : vector<16x192xbf16> to vector<16x16xbf16>
      %128 = vector.shape_cast %127 : vector<16x16xbf16> to vector<2x8x16xbf16>
      %c3_79 = arith.constant 3 : index
      %c0_80 = arith.constant 0 : index
      %c0_81 = arith.constant 0 : index
      %c0_82 = arith.constant 0 : index
      %129 = vector.load %arg20[%c3_79, %c0_80, %c0_81, %c0_82] : memref<4x2x8x16xbf16, #tpu.memory_space<vmem>>, vector<1x2x8x16xbf16>
      %130 = vector.shape_cast %129 : vector<1x2x8x16xbf16> to vector<2x8x16xbf16>
      %131 = vector.shape_cast %128 : vector<2x8x16xbf16> to vector<1x2x8x16xbf16>
      tpu.vector_store %arg20[%c3_79, %c0_80, %c0_81, %c0_82], %131 {strides = array<i32>} : memref<4x2x8x16xbf16, #tpu.memory_space<vmem>>, vector<1x2x8x16xbf16>,
      %132 = vector.extract_strided_slice %76 {offsets = [0, 176], sizes = [16, 16], strides = [1, 1]} : vector<16x192xbf16> to vector<16x16xbf16>
      %133 = vector.shape_cast %132 : vector<16x16xbf16> to vector<2x8x16xbf16>
      %c3_83 = arith.constant 3 : index
      %c0_84 = arith.constant 0 : index
      %c0_85 = arith.constant 0 : index
      %c0_86 = arith.constant 0 : index
      %134 = vector.load %arg21[%c3_83, %c0_84, %c0_85, %c0_86] : memref<4x2x8x16xbf16, #tpu.memory_space<vmem>>, vector<1x2x8x16xbf16>
      %135 = vector.shape_cast %134 : vector<1x2x8x16xbf16> to vector<2x8x16xbf16>
      %136 = vector.shape_cast %133 : vector<2x8x16xbf16> to vector<1x2x8x16xbf16>
      tpu.vector_store %arg21[%c3_83, %c0_84, %c0_85, %c0_86], %136 {strides = array<i32>} : memref<4x2x8x16xbf16, #tpu.memory_space<vmem>>, vector<1x2x8x16xbf16>,
      %c0_87 = arith.constant 0 : index
      %c0_88 = arith.constant 0 : index
      %c0_89 = arith.constant 0 : index
      %c0_90 = arith.constant 0 : index
      %137 = vector.load %arg19[%c0_87, %c0_88, %c0_89, %c0_90] : memref<4x2x8x16xbf16, #tpu.memory_space<vmem>>, vector<4x2x8x16xbf16>
      %138 = vector.shape_cast %137 : vector<4x2x8x16xbf16> to vector<8x8x16xbf16>
      %c0_91 = arith.constant 0 : index
      %c0_92 = arith.constant 0 : index
      %c0_93 = arith.constant 0 : index
      %c0_94 = arith.constant 0 : index
      %139 = vector.load %arg20[%c0_91, %c0_92, %c0_93, %c0_94] : memref<4x2x8x16xbf16, #tpu.memory_space<vmem>>, vector<4x2x8x16xbf16>
      %140 = vector.shape_cast %139 : vector<4x2x8x16xbf16> to vector<8x8x16xbf16>
      %c0_95 = arith.constant 0 : index
      %c0_96 = arith.constant 0 : index
      %c0_97 = arith.constant 0 : index
      %c0_98 = arith.constant 0 : index
      %141 = vector.load %arg21[%c0_95, %c0_96, %c0_97, %c0_98] : memref<4x2x8x16xbf16, #tpu.memory_space<vmem>>, vector<4x2x8x16xbf16>
      %142 = vector.shape_cast %141 : vector<4x2x8x16xbf16> to vector<8x8x16xbf16>
      "tpu.trace_start"() <{level = 10 : i32, message = "nqd,nkd->nqk"}> : () -> ()
      %cst_99 = arith.constant dense<0.000000e+00> : vector<8x8x8xf32>
      %143 = tpu.matmul %138, %140, %cst_99 {dimension_numbers = #tpu.dot_dimension_numbers<[2], [2], [1], [1], [0, 0, 0, 1, 1, 1], [0], [0]>} : vector<8x8x16xbf16>, vector<8x8x16xbf16>, vector<8x8x8xf32> -> vector<8x8x8xf32>
      "tpu.trace_stop"() : () -> ()
      %cst_100 = arith.constant dense<0xFF800000> : vector<8x8xf32>
      %144 = vector.multi_reduction <maximumf>, %143, %cst_100 [2] : vector<8x8x8xf32> to vector<8x8xf32>
      %145 = vector.shape_cast %144 : vector<8x8xf32> to vector<8x8x1xf32>
      %146 = vector.broadcast %145 : vector<8x8x1xf32> to vector<8x8x8xf32>
      %147 = arith.subf %143, %146 : vector<8x8x8xf32>
      %148 = math.exp %147 : vector<8x8x8xf32>
      %cst_101 = arith.constant dense<0.000000e+00> : vector<8x8xf32>
      %149 = vector.multi_reduction <add>, %148, %cst_101 [2] : vector<8x8x8xf32> to vector<8x8xf32>
      %150 = vector.shape_cast %149 : vector<8x8xf32> to vector<8x8x1xf32>
      %151 = tpu.reciprocal %150 {approx = true} : vector<8x8x1xf32> -> vector<8x8x1xf32>
      %152 = vector.broadcast %151 : vector<8x8x1xf32> to vector<8x8x8xf32>
      %153 = arith.mulf %148, %152 : vector<8x8x8xf32>
      %154 = arith.truncf %153 : vector<8x8x8xf32> to vector<8x8x8xbf16>
      "tpu.trace_start"() <{level = 10 : i32, message = "nqk,nkd->nqd"}> : () -> ()
      %cst_102 = arith.constant dense<0.000000e+00> : vector<8x8x16xf32>
      %155 = tpu.matmul %154, %142, %cst_102 {dimension_numbers = #tpu.dot_dimension_numbers<[2], [1], [1], [2], [0, 0, 0, 1, 1, 2], [0], [0]>} : vector<8x8x8xbf16>, vector<8x8x16xbf16>, vector<8x8x16xf32> -> vector<8x8x16xf32>
      "tpu.trace_stop"() : () -> ()
      %156 = vector.shape_cast %155 : vector<8x8x16xf32> to vector<4x16x16xf32>
      %157 = vector.extract_strided_slice %156 {offsets = [0, 0, 0], sizes = [1, 16, 16], strides = [1, 1, 1]} : vector<4x16x16xf32> to vector<1x16x16xf32>
      %158 = vector.shape_cast %157 : vector<1x16x16xf32> to vector<16x16xf32>
      %c0_103 = arith.constant 0 : index
      %c0_104 = arith.constant 0 : index
      %159 = vector.load %arg22[%c0_103, %c0_104] : memref<16x64xf32, #tpu.memory_space<vmem>>, vector<16x16xf32>
      tpu.vector_store %arg22[%c0_103, %c0_104], %158 {strides = array<i32>} : memref<16x64xf32, #tpu.memory_space<vmem>>, vector<16x16xf32>,
      %160 = vector.extract_strided_slice %156 {offsets = [1, 0, 0], sizes = [1, 16, 16], strides = [1, 1, 1]} : vector<4x16x16xf32> to vector<1x16x16xf32>
      %161 = vector.shape_cast %160 : vector<1x16x16xf32> to vector<16x16xf32>
      %c0_105 = arith.constant 0 : index
      %c16 = arith.constant 16 : index
      %162 = vector.load %arg22[%c0_105, %c16] : memref<16x64xf32, #tpu.memory_space<vmem>>, vector<16x16xf32>
      tpu.vector_store %arg22[%c0_105, %c16], %161 {strides = array<i32>} : memref<16x64xf32, #tpu.memory_space<vmem>>, vector<16x16xf32>,
      %163 = vector.extract_strided_slice %156 {offsets = [2, 0, 0], sizes = [1, 16, 16], strides = [1, 1, 1]} : vector<4x16x16xf32> to vector<1x16x16xf32>
      %164 = vector.shape_cast %163 : vector<1x16x16xf32> to vector<16x16xf32>
      %c0_106 = arith.constant 0 : index
      %c32 = arith.constant 32 : index
      %165 = vector.load %arg22[%c0_106, %c32] : memref<16x64xf32, #tpu.memory_space<vmem>>, vector<16x16xf32>
      tpu.vector_store %arg22[%c0_106, %c32], %164 {strides = array<i32>} : memref<16x64xf32, #tpu.memory_space<vmem>>, vector<16x16xf32>,
      %166 = vector.extract_strided_slice %156 {offsets = [3, 0, 0], sizes = [1, 16, 16], strides = [1, 1, 1]} : vector<4x16x16xf32> to vector<1x16x16xf32>
      %167 = vector.shape_cast %166 : vector<1x16x16xf32> to vector<16x16xf32>
      %c0_107 = arith.constant 0 : index
      %c48 = arith.constant 48 : index
      %168 = vector.load %arg22[%c0_107, %c48] : memref<16x64xf32, #tpu.memory_space<vmem>>, vector<16x16xf32>
      tpu.vector_store %arg22[%c0_107, %c48], %167 {strides = array<i32>} : memref<16x64xf32, #tpu.memory_space<vmem>>, vector<16x16xf32>,
      %c0_108 = arith.constant 0 : index
      %c0_109 = arith.constant 0 : index
      %169 = vector.load %arg22[%c0_108, %c0_109] : memref<16x64xf32, #tpu.memory_space<vmem>>, vector<16x64xf32>
      %170 = arith.truncf %169 : vector<16x64xf32> to vector<16x64xbf16>
      %c0_110 = arith.constant 0 : index
      %c0_111 = arith.constant 0 : index
      %c0_112 = arith.constant 0 : index
      %171 = vector.load %arg7[%c0_110, %c0_111, %c0_112] : memref<1x64x64xbf16, #tpu.memory_space<vmem>>, vector<1x64x64xbf16>
      %172 = vector.shape_cast %171 : vector<1x64x64xbf16> to vector<64x64xbf16>
      %cst_113 = arith.constant dense<0.000000e+00> : vector<16x64xf32>
      %173 = tpu.matmul %170, %172, %cst_113 {dimension_numbers = #tpu.dot_dimension_numbers<[1], [0], [0], [1], [0, 0, 1, 1], [], []>} : vector<16x64xbf16>, vector<64x64xbf16>, vector<16x64xf32> -> vector<16x64xf32>
      %c0_114 = arith.constant 0 : index
      %c0_115 = arith.constant 0 : index
      %c0_116 = arith.constant 0 : index
      %174 = vector.load %arg8[%c0_114, %c0_115, %c0_116] : memref<1x1x64xf32, #tpu.memory_space<vmem>>, vector<1x1x64xf32>
      %175 = vector.shape_cast %174 : vector<1x1x64xf32> to vector<1x64xf32>
      %176 = vector.broadcast %175 : vector<1x64xf32> to vector<16x64xf32>
      %177 = arith.addf %173, %176 : vector<16x64xf32>
      %178 = arith.addf %41, %177 : vector<16x64xf32>
      %c0_117 = arith.constant 0 : index
      %c0_118 = arith.constant 0 : index
      %c0_119 = arith.constant 0 : index
      %179 = vector.load %arg16[%c0_117, %c0_118, %c0_119] : memref<1x1x64xf32, #tpu.memory_space<vmem>>, vector<1x1x64xf32>
      %180 = vector.shape_cast %179 : vector<1x1x64xf32> to vector<1x64xf32>
      %181 = vector.broadcast %180 : vector<1x64xf32> to vector<16x64xf32>
      %182 = arith.addf %178, %181 : vector<16x64xf32>
      %183 = vector.shape_cast %182 : vector<16x64xf32> to vector<2x8x64xf32>
      %184 = arith.index_cast %1 : i32 to index
      %c0_120 = arith.constant 0 : index
      %c0_121 = arith.constant 0 : index
      %185 = vector.load %arg18[%184, %c0_120, %c0_121] : memref<4x8x64xf32, #tpu.memory_space<vmem>>, vector<2x8x64xf32>
      tpu.vector_store %arg18[%184, %c0_120, %c0_121], %183 {strides = array<i32>} : memref<4x8x64xf32, #tpu.memory_space<vmem>>, vector<2x8x64xf32>,
      %cst_122 = arith.constant dense<0.000000e+00> : vector<16xf32>
      %186 = vector.multi_reduction <add>, %178, %cst_122 [1] : vector<16x64xf32> to vector<16xf32>
      %187 = vector.shape_cast %186 : vector<16xf32> to vector<16x1xf32>
      %cst_123 = arith.constant 6.400000e+01 : f32
      %188 = vector.broadcast %cst_123 : f32 to vector<16x1xf32>
      %189 = arith.divf %187, %188 : vector<16x1xf32>
      %190 = vector.broadcast %189 : vector<16x1xf32> to vector<16x64xf32>
      %191 = arith.subf %178, %190 : vector<16x64xf32>
      %192 = arith.mulf %191, %191 : vector<16x64xf32>
      %cst_124 = arith.constant dense<0.000000e+00> : vector<16xf32>
      %193 = vector.multi_reduction <add>, %192, %cst_124 [1] : vector<16x64xf32> to vector<16xf32>
      %194 = vector.shape_cast %193 : vector<16xf32> to vector<16x1xf32>
      %cst_125 = arith.constant 6.400000e+01 : f32
      %195 = vector.broadcast %cst_125 : f32 to vector<16x1xf32>
      %196 = arith.divf %194, %195 : vector<16x1xf32>
      %197 = vector.broadcast %189 : vector<16x1xf32> to vector<16x64xf32>
      %198 = arith.subf %178, %197 : vector<16x64xf32>
      %cst_126 = arith.constant 9.99999974E-6 : f32
      %199 = vector.broadcast %cst_126 : f32 to vector<16x1xf32>
      %200 = arith.addf %196, %199 : vector<16x1xf32>
      %201 = math.rsqrt %200 : vector<16x1xf32>
      %202 = vector.broadcast %201 : vector<16x1xf32> to vector<16x64xf32>
      %203 = arith.mulf %198, %202 : vector<16x64xf32>
      %c0_127 = arith.constant 0 : index
      %c0_128 = arith.constant 0 : index
      %c0_129 = arith.constant 0 : index
      %204 = vector.load %arg11[%c0_127, %c0_128, %c0_129] : memref<1x1x64xf32, #tpu.memory_space<vmem>>, vector<1x1x64xf32>
      %205 = vector.shape_cast %204 : vector<1x1x64xf32> to vector<1x64xf32>
      %206 = vector.broadcast %205 : vector<1x64xf32> to vector<16x64xf32>
      %207 = arith.mulf %203, %206 : vector<16x64xf32>
      %c0_130 = arith.constant 0 : index
      %c0_131 = arith.constant 0 : index
      %c0_132 = arith.constant 0 : index
      %208 = vector.load %arg12[%c0_130, %c0_131, %c0_132] : memref<1x1x64xf32, #tpu.memory_space<vmem>>, vector<1x1x64xf32>
      %209 = vector.shape_cast %208 : vector<1x1x64xf32> to vector<1x64xf32>
      %210 = vector.broadcast %209 : vector<1x64xf32> to vector<16x64xf32>
      %211 = arith.addf %207, %210 : vector<16x64xf32>
      %212 = arith.truncf %211 : vector<16x64xf32> to vector<16x64xbf16>
      %c0_133 = arith.constant 0 : index
      %c0_134 = arith.constant 0 : index
      %213 = vector.load %arg23[%c0_133, %c0_134] : memref<16x64xbf16, #tpu.memory_space<vmem>>, vector<16x64xbf16>
      tpu.vector_store %arg23[%c0_133, %c0_134], %212 {strides = array<i32>} : memref<16x64xbf16, #tpu.memory_space<vmem>>, vector<16x64xbf16>,
    } else {
    }
    %c0 = arith.constant 0 : index
    %c0_4 = arith.constant 0 : index
    %10 = vector.load %arg23[%c0, %c0_4] : memref<16x64xbf16, #tpu.memory_space<vmem>>, vector<16x64xbf16>
    %c0_5 = arith.constant 0 : index
    %c0_6 = arith.constant 0 : index
    %c0_7 = arith.constant 0 : index
    %11 = vector.load %arg13[%c0_5, %c0_6, %c0_7] : memref<1x64x128xbf16, #tpu.memory_space<vmem>>, vector<1x64x128xbf16>
    %12 = vector.shape_cast %11 : vector<1x64x128xbf16> to vector<64x128xbf16>
    %cst = arith.constant dense<0.000000e+00> : vector<16x128xf32>
    %13 = tpu.matmul %10, %12, %cst {dimension_numbers = #tpu.dot_dimension_numbers<[1], [0], [0], [1], [0, 0, 1, 1], [], []>} : vector<16x64xbf16>, vector<64x128xbf16>, vector<16x128xf32> -> vector<16x128xf32>
    %c0_8 = arith.constant 0 : index
    %c0_9 = arith.constant 0 : index
    %c0_10 = arith.constant 0 : index
    %14 = vector.load %arg14[%c0_8, %c0_9, %c0_10] : memref<1x1x128xf32, #tpu.memory_space<vmem>>, vector<1x1x128xf32>
    %15 = vector.shape_cast %14 : vector<1x1x128xf32> to vector<1x128xf32>
    %16 = vector.broadcast %15 : vector<1x128xf32> to vector<16x128xf32>
    %17 = arith.addf %13, %16 : vector<16x128xf32>
    %cst_11 = arith.constant 1.702000e+00 : f32
    %18 = vector.broadcast %cst_11 : f32 to vector<16x128xf32>
    %19 = arith.mulf %18, %17 : vector<16x128xf32>
    %20 = arith.negf %19 : vector<16x128xf32>
    %21 = math.exp %20 : vector<16x128xf32>
    %cst_12 = arith.constant 1.000000e+00 : f32
    %22 = vector.broadcast %cst_12 : f32 to vector<16x128xf32>
    %23 = arith.addf %22, %21 : vector<16x128xf32>
    %24 = arith.divf %22, %23 : vector<16x128xf32>
    %25 = arith.mulf %17, %24 : vector<16x128xf32>
    %26 = arith.truncf %25 : vector<16x128xf32> to vector<16x128xbf16>
    %c0_13 = arith.constant 0 : index
    %c0_14 = arith.constant 0 : index
    %c0_15 = arith.constant 0 : index
    %27 = vector.load %arg15[%c0_13, %c0_14, %c0_15] : memref<1x128x64xbf16, #tpu.memory_space<vmem>>, vector<1x128x64xbf16>
    %28 = vector.shape_cast %27 : vector<1x128x64xbf16> to vector<128x64xbf16>
    %cst_16 = arith.constant dense<0.000000e+00> : vector<16x64xf32>
    %29 = tpu.matmul %26, %28, %cst_16 {dimension_numbers = #tpu.dot_dimension_numbers<[1], [0], [0], [1], [0, 0, 1, 1], [], []>} : vector<16x128xbf16>, vector<128x64xbf16>, vector<16x64xf32> -> vector<16x64xf32>
    %30 = arith.index_cast %1 : i32 to index
    %c0_17 = arith.constant 0 : index
    %c0_18 = arith.constant 0 : index
    %31 = vector.load %arg18[%30, %c0_17, %c0_18] : memref<4x8x64xf32, #tpu.memory_space<vmem>>, vector<2x8x64xf32>
    %32 = vector.shape_cast %29 : vector<16x64xf32> to vector<2x8x64xf32>
    %33 = arith.addf %31, %32 : vector<2x8x64xf32>
    %34 = arith.index_cast %1 : i32 to index
    %c0_19 = arith.constant 0 : index
    %c0_20 = arith.constant 0 : index
    %35 = vector.load %arg18[%34, %c0_19, %c0_20] : memref<4x8x64xf32, #tpu.memory_space<vmem>>, vector<2x8x64xf32>
    tpu.vector_store %arg18[%34, %c0_19, %c0_20], %33 {strides = array<i32>} : memref<4x8x64xf32, #tpu.memory_space<vmem>>, vector<2x8x64xf32>,
    %c1_i32 = arith.constant 1 : i32
    %36 = arith.cmpi eq, %arg2, %c1_i32 : i32
    %37 = arith.extui %36 : i1 to i32
    %c0_i32_21 = arith.constant 0 : i32
    %38 = arith.cmpi ne, %37, %c0_i32_21 : i32
    scf.if %38 {
      %39 = arith.index_cast %1 : i32 to index
      %c0_22 = arith.constant 0 : index
      %c0_23 = arith.constant 0 : index
      %40 = vector.load %arg18[%39, %c0_22, %c0_23] : memref<4x8x64xf32, #tpu.memory_space<vmem>>, vector<2x8x64xf32>
      %c0_24 = arith.constant 0 : index
      %c0_25 = arith.constant 0 : index
      %c0_26 = arith.constant 0 : index
      %c0_27 = arith.constant 0 : index
      %41 = vector.load %arg17[%c0_24, %c0_25, %c0_26, %c0_27] : memref<1x2x8x64xf32, #tpu.memory_space<vmem>>, vector<1x2x8x64xf32>
      %42 = vector.shape_cast %41 : vector<1x2x8x64xf32> to vector<2x8x64xf32>
      %43 = vector.shape_cast %40 : vector<2x8x64xf32> to vector<1x2x8x64xf32>
      tpu.vector_store %arg17[%c0_24, %c0_25, %c0_26, %c0_27], %43 {strides = array<i32>} : memref<1x2x8x64xf32, #tpu.memory_space<vmem>>, vector<1x2x8x64xf32>,
    } else {
    }
    return
  }
  func.func @transform_0(%arg0: i32, %arg1: i32, %arg2: i32, %arg3: memref<5xi32, #tpu.memory_space<smem>>) -> (i32, i32, i32) {
    %c0_i32 = arith.constant 0 : i32
    %0 = arith.cmpi eq, %arg0, %c0_i32 : i32
    %c0_i32_0 = arith.constant 0 : i32
    %1 = arith.select %0, %arg1, %c0_i32_0 : i32
    %c0_i32_1 = arith.constant 0 : i32
    %c0_i32_2 = arith.constant 0 : i32
    %c0_i32_3 = arith.constant 0 : i32
    return %1, %c0_i32_1, %c0_i32_2 : i32, i32, i32
  }
  func.func @transform_1(%arg0: i32, %arg1: i32, %arg2: i32, %arg3: memref<5xi32, #tpu.memory_space<smem>>) -> (i32, i32, i32) {
    %c0_i32 = arith.constant 0 : i32
    %c0_i32_0 = arith.constant 0 : i32
    %c0_i32_1 = arith.constant 0 : i32
    return %arg0, %c0_i32, %c0_i32_0 : i32, i32, i32
  }
  func.func @transform_2(%arg0: i32, %arg1: i32, %arg2: i32, %arg3: memref<5xi32, #tpu.memory_space<smem>>) -> (i32, i32, i32) {
    %c0_i32 = arith.constant 0 : i32
    %c0_i32_0 = arith.constant 0 : i32
    %c0_i32_1 = arith.constant 0 : i32
    return %arg0, %c0_i32, %c0_i32_0 : i32, i32, i32
  }
  func.func @transform_3(%arg0: i32, %arg1: i32, %arg2: i32, %arg3: memref<5xi32, #tpu.memory_space<smem>>) -> (i32, i32, i32) {
    %c0_i32 = arith.constant 0 : i32
    %c0_i32_0 = arith.constant 0 : i32
    %c0_i32_1 = arith.constant 0 : i32
    return %arg0, %c0_i32, %c0_i32_0 : i32, i32, i32
  }
  func.func @transform_4(%arg0: i32, %arg1: i32, %arg2: i32, %arg3: memref<5xi32, #tpu.memory_space<smem>>) -> (i32, i32, i32) {
    %c0_i32 = arith.constant 0 : i32
    %c0_i32_0 = arith.constant 0 : i32
    %c0_i32_1 = arith.constant 0 : i32
    return %arg0, %c0_i32, %c0_i32_0 : i32, i32, i32
  }
  func.func @transform_5(%arg0: i32, %arg1: i32, %arg2: i32, %arg3: memref<5xi32, #tpu.memory_space<smem>>) -> (i32, i32, i32) {
    %c0_i32 = arith.constant 0 : i32
    %c0_i32_0 = arith.constant 0 : i32
    %c0_i32_1 = arith.constant 0 : i32
    return %arg0, %c0_i32, %c0_i32_0 : i32, i32, i32
  }
  func.func @transform_6(%arg0: i32, %arg1: i32, %arg2: i32, %arg3: memref<5xi32, #tpu.memory_space<smem>>) -> (i32, i32, i32) {
    %c0_i32 = arith.constant 0 : i32
    %c0_i32_0 = arith.constant 0 : i32
    %c0_i32_1 = arith.constant 0 : i32
    return %arg0, %c0_i32, %c0_i32_0 : i32, i32, i32
  }
  func.func @transform_7(%arg0: i32, %arg1: i32, %arg2: i32, %arg3: memref<5xi32, #tpu.memory_space<smem>>) -> (i32, i32, i32) {
    %c0_i32 = arith.constant 0 : i32
    %c0_i32_0 = arith.constant 0 : i32
    %c0_i32_1 = arith.constant 0 : i32
    return %arg0, %c0_i32, %c0_i32_0 : i32, i32, i32
  }
  func.func @transform_8(%arg0: i32, %arg1: i32, %arg2: i32, %arg3: memref<5xi32, #tpu.memory_space<smem>>) -> (i32, i32, i32) {
    %c0_i32 = arith.constant 0 : i32
    %c0_i32_0 = arith.constant 0 : i32
    %c0_i32_1 = arith.constant 0 : i32
    return %arg0, %c0_i32, %c0_i32_0 : i32, i32, i32
  }
  func.func @transform_9(%arg0: i32, %arg1: i32, %arg2: i32, %arg3: memref<5xi32, #tpu.memory_space<smem>>) -> (i32, i32, i32) {
    %c0_i32 = arith.constant 0 : i32
    %c0_i32_0 = arith.constant 0 : i32
    return %arg0, %c0_i32, %arg2 : i32, i32, i32
  }
  func.func @transform_10(%arg0: i32, %arg1: i32, %arg2: i32, %arg3: memref<5xi32, #tpu.memory_space<smem>>) -> (i32, i32, i32) {
    %c0_i32 = arith.constant 0 : i32
    %c0_i32_0 = arith.constant 0 : i32
    return %arg0, %c0_i32, %arg2 : i32, i32, i32
  }
  func.func @transform_11(%arg0: i32, %arg1: i32, %arg2: i32, %arg3: memref<5xi32, #tpu.memory_space<smem>>) -> (i32, i32, i32) {
    %c0_i32 = arith.constant 0 : i32
    %c0_i32_0 = arith.constant 0 : i32
    return %arg0, %arg2, %c0_i32 : i32, i32, i32
  }
  func.func @transform_12(%arg0: i32, %arg1: i32, %arg2: i32, %arg3: memref<5xi32, #tpu.memory_space<smem>>) -> (i32, i32, i32) {
    %c0_i32 = arith.constant 0 : i32
    %c0_i32_0 = arith.constant 0 : i32
    %c0_i32_1 = arith.constant 0 : i32
    return %arg0, %c0_i32, %c0_i32_0 : i32, i32, i32
  }
  func.func @transform_13(%arg0: i32, %arg1: i32, %arg2: i32, %arg3: memref<5xi32, #tpu.memory_space<smem>>) -> (i32, i32, i32, i32) {
    %0 = arith.index_cast %arg0 : i32 to index
    %1 = memref.load %arg3[%0] : memref<5xi32, #tpu.memory_space<smem>>
    %c0_i32 = arith.constant 0 : i32
    %c0_i32_0 = arith.constant 0 : i32
    %c0_i32_1 = arith.constant 0 : i32
    return %1, %arg1, %c0_i32, %c0_i32_0 : i32, i32, i32, i32
  }
}

</mosaic_0001>

<bundles_post_ra>
// kernel: tpu_custom_call.1
= control target key start
LH: loop header
LB: loop body
LE: loop exit
PB: predicated region body
PF: predicated region fallthrough
CT: control target
= control target key end

     0   :  { %s3891_s0 = inlined_call_operand.vmem [shape: s32[5], index: 0, kind: input, shape index: {}]   ;;  %s3892_s1 = inlined_call_operand.vmem [shape: bf16[4,8,64], index: 1, kind: input, shape index: {}]   ;;  %s3893_s2 = inlined_call_operand.vmem [shape: bf16[5,64,192], index: 2, kind: input, shape index: {}]   ;;  %s3894_s3 = inlined_call_operand.vmem [shape: f32[5,1,192], index: 3, kind: input, shape index: {}]   ;;  %s3895_s4 = inlined_call_operand.vmem [shape: bf16[5,64,64], index: 4, kind: input, shape index: {}]   ;;  %s3896_s5 = inlined_call_operand.vmem [shape: f32[5,1,64], index: 5, kind: input, shape index: {}]   ;;  %s3897_s6 = inlined_call_operand.vmem [shape: f32[5,1,64], index: 6, kind: input, shape index: {}]   ;;  %s3898_s7 = inlined_call_operand.vmem [shape: f32[5,1,64], index: 7, kind: input, shape index: {}]   ;;  %s3899_s8 = inlined_call_operand.vmem [shape: f32[5,1,64], index: 8, kind: input, shape index: {}]   ;;  %s3900_s9 = inlined_call_operand.vmem [shape: f32[5,1,64], index: 9, kind: input, shape index: {}]   ;;  %s3901_s10 = inlined_call_operand.vmem [shape: bf16[5,64,256], index: 10, kind: input, shape index: {}]   ;;  %s3902_s11 = inlined_call_operand.vmem [shape: f32[5,1,256], index: 11, kind: input, shape index: {}]   ;;  %s3903_s12 = inlined_call_operand.vmem [shape: bf16[5,256,64], index: 12, kind: input, shape index: {}]   ;;  %s3904_s13 = inlined_call_operand.vmem [shape: f32[5,1,64], index: 13, kind: input, shape index: {}]   ;;  %s3905_s14 = inlined_call_operand.hbm [shape: f32[2,4,8,64], index: 14, kind: output, shape index: {}]  }
   0x1   :  { %3925 = sst [smem:[#allocation34_spill]] %s3892_s1  ;;  %s19_s15 = sshll.u32 %s3891_s0, 4  ;;  %s20_s15 = int_to_ptr.vmem [resolvable:$true] %s19_s15 }
   0x2   :  { %3926 = sst [smem:[#allocation35_spill]] %s3893_s2  ;;  %s3071_s16 = scalar_lea.vmem %s20_s15, 16 }
   0x3   :  { %3927 = sst [smem:[#allocation36_spill]] %s3894_s3  ;;  %p3072_p0 = scmp.ne.s32.totalorder %s20_s15, %s3071_s16 }
   0x4   :  { %3928 = sst [smem:[#allocation37_spill]] %s3895_s4  ;;  %p3076_p1 = scmp.lt.s32.totalorder %s20_s15, %s20_s15 }
   0x5   :  { %3929 = sst [smem:[#allocation38_spill]] %s3896_s5  ;;  %p3077_p2 = scmp.lt.s32.totalorder %s3071_s16, %s3071_s16 }
   0x6   :  { %3930 = sst [smem:[#allocation39_spill]] %s3897_s6 }
   0x7   :  { %3931 = sst [smem:[#allocation40_spill]] %s3898_s7  ;;  %p3078_p3 = por %p3077_p2, %p3076_p1 }
   0x8   :  { %3932 = sst [smem:[#allocation41_spill]] %s3899_s8 }
   0x9   :  { %3933 = sst [smem:[#allocation42_spill]] %s3900_s9  ;;  %p3079_p4 = pnand %p3078_p3, %p3072_p0 }
   0xa   :  { %3934 = sst [smem:[#allocation43_spill]] %s3901_s10 }
   0xb   :  { %3935 = sst [smem:[#allocation44_spill]] %s3902_s11 }
   0xc   :  { %3936 = sst [smem:[#allocation45_spill]] %s3903_s12 }
   0xd   :  { %3937 = sst [smem:[#allocation46_spill]] %s3904_s13 }
   0xe   :  { %3938 = sst [smem:[#allocation47_spill]] %s3905_s14 }
   0xf   :  { %3082 = shalt.err (!%p3079_p4)  }
  0x10   :  { %s3213_s17 = smov [#allocation9]  }
  0x11   :  { %22 = dma.vmem_to_smem %s20_s15, 16, %s3213_s17, [#allocation8] }
  0x12   :  { %3159 = dma.done.wait [#allocation8], 16 }
  0x13   :  { %3160 = vsyncadd [#allocation8], 4294967280 }
  0x14   :  { %24 = sfence }
  0x15   :  { %25 = vsyncpa [#allocation12], 0 }
  0x16   :  { %27 = vsyncpa [#allocation12 + $0x1], 0  ;;  %s3307_s18 = smov 0   ;;  %s3309_s19 = smov 0  }
  0x17   :  { %s3311_s0 = smov 0   ;;  %s3313_s20 = smov 0  }
  0x18   :  { %s3315_s21 = smov 0   ;;  %s3317_s22 = smov 0  }
  0x19   :  { %s3319_s23 = smov 0   ;;  %s3321_s24 = smov 0  }
  0x1a   :  { %s3323_s25 = smov 0   ;;  %s3325_s26 = smov 0  }
  0x1b   :  { %s3327_s27 = smov 0   ;;  %s3329_s28 = smov 0  }
  0x1c LB: > { %3939 = sst [smem:[#allocation16_spill]] %s3167_s18  ;;  %s45_s29 = sadd.s32 1, %s3199_s25  ;;  %s3211_s28 = sphi %s3329_s28, %s33_s28   ;;  %s3207_s27 = sphi %s3327_s27, %s4002_s27   ;;  %s3203_s26 = sphi %s3325_s26, %s4001_s26   ;;  %s3199_s25 = sphi %s3323_s25, %s4000_s25   ;;  %s3195_s24 = sphi %s3321_s24, %s3999_s24   ;;  %s3191_s23 = sphi %s3319_s23, %s3998_s23   ;;  %s3187_s22 = sphi %s3317_s22, %s3997_s22   ;;  %s3183_s21 = sphi %s3315_s21, %s3996_s21   ;;  %s3179_s20 = sphi %s3313_s20, %s3995_s20   ;;  %s3175_s0 = sphi %s3311_s0, %s3994_s0   ;;  %s3171_s19 = sphi %s3309_s19, %s3993_s19   ;;  %s3167_s18 = sphi %s3307_s18, %s3992_s18  }
  0x1d   : > { %3940 = sst [smem:[#allocation17_spill]] %s3171_s19  ;;  %p46_p5 = scmp.ge.s32.totalorder %s45_s29, 2 }
  0x1e   : > { %3941 = sst [smem:[#allocation18_spill]] %s3175_s0  ;;  %s48_s30 = sadd.s32 1, %s3203_s26 }
  0x1f   : > { %3942 = sst [smem:[#allocation19_spill]] %s3183_s21  ;;  %s2582_s15 = sadd.s32 4294967295, %s3211_s28  }
  0x20   : > { %3943 = sst [smem:[#allocation20_spill]] %s3199_s25  ;;  %p306_p6 = scmp.ne.s32.totalorder %s3183_s21, %s3179_s20 }
  0x21   : > { %3944 = sst [smem:[#allocation21_spill]] %s3203_s26  ;;  %s4004_s29 = smov (%p46_p5, %s45_s29), 0 }
  0x22   : > { %3945 = sst [smem:[#allocation22_spill]] %s3207_s27  ;;  %s4006_s30 = smov (!%p46_p5, %s48_s30), %s3203_s26 }
  0x23   : > { %3946 = sst [smem:[#allocation23_spill]] %s3211_s28  ;;  %s2583_s16 = sadd.s32 4294967294, %s3211_s28  }
  0x24   : > { %3947 = sst [smem:[#allocation24_spill]] %s4004_s29  ;;  %p307_p7 = scmp.eq.s32.totalorder %s3211_s28, 0 }
  0x25   : > { %p50_p8 = scmp.ge.s32.totalorder %s4006_s30, 2  ;;  %s52_s17 = sadd.s32 1, %s3207_s27 }
  0x26   : > { %s295_s14 = ssub.s32 %s3199_s25, %s4004_s29  ;;  %p3380_p9 = por %p307_p7, %p306_p6 }
  0x27   : > { %s4008_s30 = smov (%p50_p8, %s4006_s30), 0  ;;  %s4010_s17 = smov (!%p50_p8, %s52_s17), %s3207_s27 }
  0x28   : > { %3949 = sst [smem:[#allocation25_spill]] %s4008_s30  ;;  %p421_p10 = scmp.ne.s32.totalorder %s3175_s0, %s3171_s19 }
  0x29   : > { %s404_s11 = sld [smem:[#allocation9 + %s3207_s27]]  ;;  %p54_p11 = scmp.ge.s32.totalorder %s4010_s17, 5 }
  0x2a   : > { %p422_p12 = scmp.eq.s32.totalorder %s2582_s15, 19  ;;  %p427_p13 = scmp.ne.s32.totalorder %s3171_s19, %s3167_s18 }
  0x2b   : > { %p428_p0 = scmp.eq.s32.totalorder %s2583_s16, 19  ;;  %s4012_s17 = smov (%p54_p11, %s4010_s17), 0 }
  0x2c   : > { %3950 = sst [smem:[#allocation26_spill]] %s4012_s17  ;;  %p3394_p1 = por %p422_p12, %p421_p10 }
  0x2d   : > { %p3398_p2 = por %p428_p0, %p427_p13  ;;  %s294_s9 = ssub.s32 %s3207_s27, %s4012_s17 }
  0x2e   : > { %s3951_s29 = scalar_select %p3394_p1, 1, 0 }
  0x2f   : > { %s3953_s13 = scalar_select %p3398_p2, 1, 0 }
  0x30   : > { %3952 = sst [smem:[#allocation27_spill]] %s3951_s29  ;;  %s296_s7 = sor.u32 %s295_s14, %s294_s9 }
  0x31   : > { %3954 = sst [smem:[#allocation28_spill]] %s3953_s13  ;;  %s299_s6 = sadd.s32 1, %s3183_s21 }
  0x32   : > { %s405_s8 = sld [smem:[#allocation9 + %s4012_s17]]  ;;  %p297_p3 = scmp.eq.s32.totalorder %s296_s7, 0 }
  0x33   : > { %s407_s15 = ssub.s32 %s3203_s26, %s4008_s30  ;;  %s411_s1 = sadd.s32 1, %s3175_s0 }
  0x34   : > { %s3409_s18 = scalar_select %p297_p3, %s3183_s21, %s299_s6  }
  0x35   : > { %p2585_p5 = scmp.ge.s32.totalorder %s3211_s28, 20 }
  0x36   : > { %3955 = sst [smem:[#allocation29_spill]] %s3409_s18 }
  0x38   : > { %s406_s16 = ssub.s32 %s404_s11, %s405_s8  ;;  %444 = sbr.rel (%p2585_p5) target bundleno = 78 (0x4e), region = 16 }
  0x39   : > { %s408_s5 = sor.u32 %s407_s15, %s406_s16 }
  0x3a   : > { %p409_p4 = scmp.eq.s32.totalorder %s408_s5, 0 }
  0x3c   : > { %s3413_s4 = scalar_select %p409_p4, %s3175_s0, %s411_s1  }
  0x3e   : > { %3956 = sst [smem:[#allocation30_spill]] %s3413_s4 }
  0x3f   : > { %513 = sbr.rel (!%p3380_p9) target bundleno = 78 (0x4e), region = 56  ;;  %s515_s9 = sand.u32 (%p3380_p9), 1, %s3183_s21  }
  0x40   : > { %s2587_s7 = sshll.u32 (%p3380_p9), %s3207_s27, 4  ;;  %s2586_s14 = sshll.u32 (%p3380_p9), %s515_s9, 5 }
  0x41   : > { %s519_s6 = sadd.s32 (%p3380_p9), %s3199_s25, %s2587_s7  ;;  %s3957_s10 = sld [smem:[#allocation43_spill]] (%p3380_p9) }
  0x42   : > { %s2588_s17 = sshll.u32 (%p3380_p9), %s519_s6, 2  ;;  %s517_s1 = scalar_lea.vmem (%p3380_p9), [#allocation10], %s2586_s14 }
  0x47   : > { %s521_s5 = scalar_lea.vmem %s3957_s10, %s2588_s17 }
  0x48   : > { %v537_v0 = vld [vmem:[%s521_s5] sm:$0xf]  ;;  %v539_v1 = vld [vmem:[%s521_s5 + $0x8] sm:$0xf]  ;;  %v541_v2 = vld [vmem:[%s521_s5 + $0x10] sm:$0xf] }
  0x49   : > { %538 = vst [vmem:[%s517_s1] sm:$0xf] %v537_v0  ;;  %540 = vst [vmem:[%s517_s1 + $0x4] sm:$0xf] %v539_v1  ;;  %v543_v3 = vld [vmem:[%s521_s5 + $0x18] sm:$0xf] }
  0x4a   : > { %542 = vst [vmem:[%s517_s1 + $0x8] sm:$0xf] %v541_v2  ;;  %v545_v4 = vld [vmem:[%s521_s5 + $0x20] sm:$0xf]  ;;  %v547_v5 = vld [vmem:[%s521_s5 + $0x28] sm:$0xf] }
  0x4b   : > { %544 = vst [vmem:[%s517_s1 + $0xc] sm:$0xf] %v543_v3  ;;  %546 = vst [vmem:[%s517_s1 + $0x10] sm:$0xf] %v545_v4  ;;  %v549_v6 = vld [vmem:[%s521_s5 + $0x30] sm:$0xf] }
  0x4c   : > { %548 = vst [vmem:[%s517_s1 + $0x14] sm:$0xf] %v547_v5  ;;  %v551_v7 = vld [vmem:[%s521_s5 + $0x38] sm:$0xf]  ;;  %550 = vst [vmem:[%s517_s1 + $0x18] sm:$0xf] %v549_v6 }
  0x4d   : > { %552 = vst [vmem:[%s517_s1 + $0x1c] sm:$0xf] %v551_v7 }
  0x4e PF: > { %p2589_p6 = scmp.ge.s32.totalorder %s3211_s28, 1  ;;  %p619_p7 = scmp.lt.s32.totalorder %s3211_s28, 21 }
  0x50   : > { %p620_p8 = pnand %p2589_p6, %p619_p7 }
  0x52   : > { %623 = sbr.rel (%p620_p8) target bundleno = 2799 (0xaef), region = 109 }
  0x59   : > { %s626_s12 = sand.u32 1, %s3179_s20   ;;  %s3910_s17 = sand.u32 1, %s3171_s19  }
  0x5a   : > { %s3428_s15 = sshll.u32 %s626_s12, 5  ;;  %s3432_s16 = sshll.u32 %s3910_s17, 4 }
  0x5b   : > { %p724_p9 = scmp.eq.s32.totalorder %s3195_s24, 0  ;;  %p734_p10 = scmp.lt.s32.totalorder %s3195_s24, 4 }
  0x5c   : > { %p765_p11 = scmp.lt.s32.totalorder %s3187_s22, 1  ;;  %s2600_s9 = sshll.u32 %s3187_s22, 4 }
  0x5d   : > { %s725_s7 = scalar_select %p724_p9, %s3191_s23, 0 }
  0x5e   : > { %s3442_s14 = scalar_select %p734_p10, %s3195_s24, 4 }
  0x5f   : > { %s2592_s20 = sshll.u32 %s725_s7, 1  ;;  %p3444_p12 = scmp.lt.s32.totalorder %s2600_s9, 31 }
  0x60   : > { %p727_p13 = scmp.lt.s32.totalorder %s2592_s20, 3  ;;  %s2671_s8 = sshll.u32 %s3442_s14, 6 }
  0x61   : > { %s3959_s2 = sld [smem:[#allocation35_spill]]  ;;  %s2596_s12 = sshll.u32 %s3442_s14, 1 }
  0x62   : > { %s4014_s20 = smov (!%p727_p13, %s2592_s20), 3  ;;  %s3961_s3 = sld [smem:[#allocation36_spill]] }
  0x63   : > { %s2672_s30 = sshll.u32 %s3442_s14, 5  ;;  %s2593_s27 = sshll.u32 %s4014_s20, 2 }
  0x64   : > { %s3963_s18 = sld [smem:[#allocation37_spill]]  ;;  %s3966_s13 = sld [smem:[#allocation38_spill]] }
  0x65   : > { %s3967_s28 = sld [smem:[#allocation39_spill]]  ;;  %s3968_s25 = sld [smem:[#allocation40_spill]] }
  0x66   : > { %s4016_s9 = smov (!%p3444_p12, %s2600_s9), 31  ;;  %p788_p0 = scmp.eq.s32.totalorder %s3187_s22, 0 }
  0x67   : > { %s3452_s1 = scalar_lea.vmem %s3959_s2, %s2671_s8  ;;  %s3965_s8 = sld [smem:[#allocation34_spill]] }
  0x68   : > { %3960 = sst [smem:[#allocation31_spill]] %s3452_s1  ;;  %s3458_s10 = scalar_lea.vmem %s3961_s3, %s2596_s12 }
  0x69   : > { %3962 = sst [smem:[#allocation32_spill]] %s3458_s10  ;;  %s3969_s10 = sld [smem:[#allocation41_spill]] }
  0x6a   : > { %s3464_s21 = scalar_lea.vmem %s3963_s18, %s2672_s30  ;;  %s750_s17 = scalar_lea.vmem %s3966_s13, %s3442_s14 }
  0x6b   : > { %3964 = sst [smem:[#allocation33_spill]] %s3464_s21  ;;  %s753_s20 = scalar_lea.vmem %s3967_s28, %s3442_s14 }
  0x6c   : > { %s756_s18 = scalar_lea.vmem %s3968_s25, %s3442_s14  ;;  %s3971_s28 = sld [smem:[#allocation46_spill]] }
  0x6d   : > { %s730_s5 = scalar_lea.vmem %s3965_s8, %s2593_s27  ;;  %s3972_s25 = sld [smem:[#allocation44_spill]] }
  0x6e   : > { %s766_s2 = scalar_select %p765_p11, %s3187_s22, 1 }
  0x6f   : > { %s759_s4 = scalar_lea.vmem %s3969_s10, %s3442_s14  ;;  %s776_s10 = sadd.s32 %s2672_s30, %s4016_s9 }
  0x70   : > { %s3494_s13 = sadd.s32 %s2596_s12, %s766_s2  ;;  %s2602_s26 = sshll.u32 %s776_s10, 2 }
  0x71   : > { %s3973_s8 = sld [smem:[#allocation45_spill]]  ;;  %p789_p3 = pnand %p788_p0, %p724_p9 }
  0x72   : > { %s782_s19 = scalar_lea.vmem %s3971_s28, %s3442_s14  ;;  %s3513_s6 = scalar_lea.vmem [#allocation10], %s3428_s15  ;;  %v2681_v8 = vld [vmem:[%s730_s5] sm:$0xff] (!%p789_p3)   ;;  %vm799_vm0 = vcmask (!%p789_p3), 523264  }
  0x73   : > { %s769_s21 = scalar_lea.vmem %s3972_s25, %s3494_s13  ;;  %s3516_s12 = scalar_lea.vmem [#allocation11], %s3432_s16  ;;  %v2682_v9 = vunpack.c.l.bf16 (!%p789_p3), %v2681_v8  ;;  %v2683_v10 = vunpack.c.h.bf16 (!%p789_p3), %v2681_v8 }
  0x74   : > { %792 = sbr.rel (%p789_p3) target bundleno = 123 (0x7b), region = 117  ;;  %s2673_s2 = sshll.u32 (!%p789_p3), %s3191_s23, 4 }
  0x75   : > { %s798_s30 = scalar_lea.vmem (!%p789_p3), [#allocation2], %s2673_s2 }
  0x76   : > { %800 = vst.msk [vmem:[%s798_s30] sm:$0xff] (!%p789_p3), %vm799_vm0, %v2682_v9  ;;  %801 = vst.msk [vmem:[%s798_s30 + $0x8] sm:$0xff] (!%p789_p3), %vm799_vm0, %v2683_v10 }
  0x77   : > { %s3508_s1 = scalar_lea.vmem %s3973_s8, %s2602_s26 }
  0x7b PF: > { %p2605_p4 = scmp.ne.s32.totalorder %s3187_s22, 0 }
  0x7c   : > { %s2674_s9 = sshll.u32 (!%p2605_p4), %s3191_s23, 4  ;;  %vm809_vm1 = vcmask (!%p2605_p4), 523264   ;;  %s3974_s16 = sld [smem:[#allocation31_spill]] (!%p2605_p4)  ;;  %v3214_v33 = vmov (!%p2605_p4), 0   ;;  %v2607_v42 = vld [vmem:[%s753_s20] ss:$0 sm:$0xff] (!%p2605_p4)  ;;  %v866_v51 = vlaneseq (!%p2605_p4) }
  0x7d   : > { %804 = sbr.rel (%p2605_p4) target bundleno = 2279 (0x8e7), region = 121  ;;  %s3521_s15 = scalar_lea.vmem (!%p2605_p4), [#allocation2], %s2674_s9  ;;  %951 = vmatprep.mubr.bf16.mxu0 (!%p2605_p4), %v3214_v33  ;;  %v2608_v46 = vld [vmem:[%s756_s18] ss:$0 sm:$0xff] (!%p2605_p4)  ;;  %v3215_v59 = vmov (!%p2605_p4), 0.0   ;;  %vm971_vm2 = vcmask (!%p2605_p4), 125952  }
  0x7e   : > { %v3524_v11 = vld [vmem:[%s3521_s15] sm:$0xff] (!%p2605_p4)  ;;  %v3527_v12 = vld [vmem:[%s3521_s15 + $0x8] sm:$0xff] (!%p2605_p4)  ;;  %s3975_s5 = sld [smem:[#allocation32_spill]] (!%p2605_p4)  ;;  %v867_v52 = vshrl.u32 (!%p2605_p4), %v866_v51, 7  ;;  %2735 = vmatprep.subr.bf16.mxu1 (!%p2605_p4), %v3215_v59  ;;  %s3216_s20 = smov (!%p2605_p4), 64   ;;  %vm3217_vm3 = vmmov (!%p2605_p4), 0  }
  0x7f   : > { %v810_v13 = vsel (!%p2605_p4), %vm809_vm1, %v3524_v11, 0.0  ;;  %v813_v14 = vsel (!%p2605_p4), %vm809_vm1, %v3527_v12, 0.0  ;;  %2737 = vmatprep.mubr.msk.bf16.mxu1 (!%p2605_p4), %vm3217_vm3, %v3215_v59  ;;  %s3218_s18 = smov (!%p2605_p4), 48   ;;  %s3219_s10 = smov (!%p2605_p4), 32   ;;  %vm1096_vm4 = vcmask (!%p2605_p4), 130048   ;;  %vm1565_vm5 = vcmask (!%p2605_p4), 1043456  }
  0x80   : > { %811 = vadd.xlane.f32.xlu0 (!%p2605_p4), %v810_v13  ;;  %v868_v53 = vsub.s32 (!%p2605_p4), 0, %v867_v52  ;;  %v872_v55 = vsub.s32 (!%p2605_p4), 1, %v867_v52  ;;  %s3220_s26 = smov (!%p2605_p4), 112   ;;  %s3221_s11 = smov (!%p2605_p4), 96   ;;  %vm1465_vm6 = vcmask (!%p2605_p4), 64512   ;;  %vm1941_vm7 = vcmask (!%p2605_p4), 261248  }
  0x81   : > { %s3222_s27 = smov (!%p2605_p4), 16   ;;  %s3223_s8 = smov (!%p2605_p4), 80   ;;  %vm1952_vm8 = vcmask (!%p2605_p4), 392448   ;;  %vm1963_vm9 = vcmask (!%p2605_p4), 523648  }
  0x82   : > { %v2995_v25 = vld [vmem:[%s3974_s16 + $0x4] ss:$8 sps:$4 sm:$0xff] (!%p2605_p4)   ;;  %v2997_v26 = vld [vmem:[%s3974_s16] ss:$8 sps:$4 sm:$0xff] (!%p2605_p4)   ;;  %v2998_v27 = vld [vmem:[%s3974_s16 + $0x14] ss:$8 sps:$4 sm:$0xff] (!%p2605_p4)  }
  0x83   : > { %919 = vmatprep.subr.bf16.mxu0 (!%p2605_p4), %v2995_v25  ;;  %v3000_v28 = vld [vmem:[%s3974_s16 + $0x10] ss:$8 sps:$4 sm:$0xff] (!%p2605_p4)   ;;  %v3001_v29 = vld [vmem:[%s3974_s16 + $0x24] ss:$8 sps:$4 sm:$0xff] (!%p2605_p4)   ;;  %v3003_v30 = vld [vmem:[%s3974_s16 + $0x20] ss:$8 sps:$4 sm:$0xff] (!%p2605_p4)  }
  0x84   : > { %814 = vadd.xlane.f32.xlu0 %v813_v14  ;;  %920 = vmatpush1.bf16.msra.mxu0 %v2997_v26  ;;  %v3004_v31 = vld [vmem:[%s3974_s16 + $0x34] ss:$8 sps:$4 sm:$0xff]   ;;  %v3006_v32 = vld [vmem:[%s3974_s16 + $0x30] ss:$8 sps:$4 sm:$0xff]   ;;  %v864_v54 = vld [vmem:[%s3975_s5] sm:$0x3] }
  0x85   : > { %921 = vmatprep.subr.bf16.mxu0 %v2998_v27  ;;  %v869_v56 = vrot.slane %v864_v54, %v868_v53  ;;  %v873_v57 = vrot.slane %v864_v54, %v872_v55  ;;  %s3978_s2 = sld [smem:[#allocation33_spill]]  ;;  %s3982_s7 = sld [smem:[#allocation42_spill]] }
  0x88   : > { %922 = vmatpush1.bf16.msra.mxu0 %v3000_v28 }
  0x89   : > { %923 = vmatprep.subr.bf16.mxu0 %v3001_v29 }
  0x8b   : > { %s3983_s25 = scalar_lea.vmem %s3982_s7, %s3442_s14 }
  0x8c   : > { %924 = vmatpush1.bf16.msra.mxu0 %v3003_v30 }
  0x8d   : > { %925 = vmatprep.subr.bf16.mxu0 %v3004_v31 }
  0x90   : > { %926 = vmatpush1.bf16.msra.mxu0 %v3006_v32 }
  0x91   : > { %2759 = vmatprep.subr.bf16.mxu0 %v3215_v59 }
 0x10d   : > { %v812_v15 = vpop.xlane.xlu0 %811 }
 0x10e   : > { %v817_v16 = vmul.f32 0.015625, %v812_v15 }
 0x110   : > { %v819_v17 = vsub.f32 %v3524_v11, %v817_v16 }
 0x111   : > { %v815_v18 = vpop.xlane.xlu0 %814 }
 0x112   : > { %v818_v19 = vmul.f32 0.015625, %v815_v18  ;;  %v821_v20 = vmul.f32 %v819_v17, %v819_v17 }
 0x114   : > { %v820_v21 = vsub.f32 %v3527_v12, %v818_v19  ;;  %v823_v22 = vsel %vm809_vm1, %v821_v20, 0.0 }
 0x115   : > { %824 = vadd.xlane.f32.xlu1 %v823_v22 }
 0x116   : > { %v822_v23 = vmul.f32 %v820_v21, %v820_v21 }
 0x118   : > { %v826_v24 = vsel %vm809_vm1, %v822_v23, 0.0 }
 0x119   : > { %827 = vadd.xlane.f32.xlu1 %v826_v24 }
 0x1a2   : > { %v825_v34 = vpop.xlane.xlu1 %824 }
 0x1a3   : > { %v829_v35 = vmul.f32 0.015625, %v825_v34 }
 0x1a5   : > { %v831_v36 = vadd.f32 1e-05, %v829_v35 }
 0x1a6   : > { %v828_v37 = vpop.xlane.xlu1 %827 }
 0x1a7   : > { %3011 = vrsqrt.f32 %v831_v36  ;;  %v830_v38 = vmul.f32 0.015625, %v828_v37 }
 0x1a9   : > { %v832_v39 = vadd.f32 1e-05, %v830_v38 }
 0x1ab   : > { %3013 = vrsqrt.f32 %v832_v39 }
 0x1b1   : > { %v3012_v40 = vpop.eup %3011 }
 0x1b2   : > { %v835_v41 = vmul.f32 %v3012_v40, %v819_v17 }
 0x1b4   : > { %v844_v45 = vmul.f32 %v2607_v42, %v835_v41 }
 0x1b5   : > { %v3014_v43 = vpop.eup %3013 }
 0x1b6   : > { %v836_v44 = vmul.f32 %v3014_v43, %v820_v21  ;;  %v853_v48 = vadd.f32 %v2608_v46, %v844_v45 }
 0x1b8   : > { %v845_v47 = vmul.f32 %v2607_v42, %v836_v44 }
 0x1ba   : > { %v854_v49 = vadd.f32 %v2608_v46, %v845_v47 }
 0x1bc   : > { %v855_v50 = vpack.c.bf16 %v854_v49, %v853_v48 }
 0x1be   : > { %2617 = vmatmul.mubr.msk.bf16.vlgmr.msra.gmra.mrb[0].mxu0 %vm809_vm1, %v855_v50 }
 0x1bf   : > { %2761 = vmatprep.mubr.msk.bf16.mxu0 %vm3217_vm3, %v3215_v59 }
 0x291   : > { %v953_v58 = vpop.f32.mrb[0].mxu0 }
 0x292   : > { %v954_v60 = vadd.f32 %v953_v58, %v869_v56  ;;  %v955_v61 = vpop.f32.mrb[1].mxu0 }
 0x293   : > { %v956_v62 = vadd.f32 %v955_v61, %v873_v57  ;;  %v957_v63 = vpop.f32.mrb[2].mxu0 }
 0x294   : > { %v2675_v0 = vpack.c.bf16 %v954_v60, %v954_v60  ;;  %v958_v1 = vadd.f32 %v957_v63, %v869_v56  ;;  %v959_v2 = vpop.f32.mrb[3].mxu0 }
 0x295   : > { %v3559_v3 = vpack.c.bf16 %v956_v62, %v956_v62  ;;  %v960_v4 = vadd.f32 %v959_v2, %v873_v57 }
 0x296   : > { %972 = vst.msk [vmem:[#allocation3] sm:$0xf] %vm971_vm2, %v2675_v0  ;;  %v2676_v5 = vpack.c.bf16 %v958_v1, %v958_v1  ;;  %974 = vrot.lane.b32.xlu0 %v2675_v0, %s3216_s20 }
 0x297   : > { %989 = vst.msk [vmem:[#allocation5] sm:$0xf] %vm971_vm2, %v3559_v3  ;;  %v3564_v6 = vpack.c.bf16 %v960_v4, %v960_v4 }
 0x298   : > { %973 = vst.msk [vmem:[#allocation3 + $0x4] sm:$0xf] %vm971_vm2, %v2676_v5  ;;  %976 = vrot.lane.b32.xlu1 %v2676_v5, %s3216_s20 }
 0x299   : > { %990 = vst.msk [vmem:[#allocation5 + $0x4] sm:$0xf] %vm971_vm2, %v3564_v6 }
 0x29a   : > { %1002 = vrot.lane.b32.xlu0 %v2676_v5, %s3218_s18 }
 0x29c   : > { %1000 = vrot.lane.b32.xlu1 %v2675_v0, %s3218_s18 }
 0x29d   : > { %v1072_v21 = vld [vmem:[#allocation3] sm:$0xf] }
 0x29e   : > { %1027 = vrot.lane.b32.xlu0 %v2675_v0, %s3219_s10  ;;  %v1088_v37 = vld [vmem:[#allocation5] sm:$0xf] }
 0x29f   : > { %v1073_v29 = vld [vmem:[#allocation3 + $0x4] sm:$0xf]  ;;  %v1567_v41 = vsel %vm1565_vm5, %v1088_v37, 0 }
 0x2a0   : > { %991 = vrot.lane.b32.xlu1 %v2675_v0, %s3220_s26  ;;  %v1089_v48 = vld [vmem:[#allocation5 + $0x4] sm:$0xf] }
 0x2a1   : > { %v1613_v50 = vsel %vm1565_vm5, %v1089_v48, 0 }
 0x2a2   : > { %1018 = vrot.lane.b32.xlu0 %v2675_v0, %s3221_s11 }
 0x2a4   : > { %993 = vrot.lane.b32.xlu1 %v2676_v5, %s3220_s26 }
 0x2a6   : > { %1054 = vrot.lane.b32.xlu0 %v2675_v0, %s3222_s27 }
 0x2a8   : > { %1029 = vrot.lane.b32.xlu1 %v2676_v5, %s3219_s10 }
 0x2aa   : > { %1045 = vrot.lane.b32.xlu0 %v2675_v0, %s3223_s8 }
 0x2ac   : > { %1020 = vrot.lane.b32.xlu1 %v2676_v5, %s3221_s11 }
 0x2b0   : > { %1056 = vrot.lane.b32.xlu1 %v2676_v5, %s3222_s27 }
 0x2b4   : > { %1047 = vrot.lane.b32.xlu1 %v2676_v5, %s3223_s8 }
 0x308   : > { %v975_v7 = vpop.permute.xlu0 %974 }
 0x309   : > { %980 = vst.msk [vmem:[#allocation4] sm:$0xf] %vm971_vm2, %v975_v7 }
 0x30a   : > { %v977_v8 = vpop.permute.xlu1 %976 }
 0x30b   : > { %981 = vst.msk [vmem:[#allocation4 + $0x4] sm:$0xf] %vm971_vm2, %v977_v8 }
 0x30c   : > { %v1003_v9 = vpop.permute.xlu0 %1002 }
 0x30d   : > { %1008 = vst.msk [vmem:[#allocation4 + $0xc] sm:$0xf] %vm971_vm2, %v1003_v9 }
 0x30e   : > { %v1001_v10 = vpop.permute.xlu1 %1000 }
 0x30f   : > { %1007 = vst.msk [vmem:[#allocation4 + $0x8] sm:$0xf] %vm971_vm2, %v1001_v10 }
 0x310   : > { %v1028_v13 = vpop.permute.xlu0 %1027  ;;  %v1080_v14 = vld [vmem:[#allocation4] sm:$0xf] }
 0x311   : > { %1034 = vst.msk [vmem:[#allocation4 + $0x10] sm:$0xf] %vm971_vm2, %v1028_v13  ;;  %v1101_v15 = vsel %vm1096_vm4, %v1080_v14, 0 }
 0x312   : > { %v992_v16 = vpop.permute.xlu1 %991  ;;  %2736 = vmatpush3.bf16.xpose.msra.mxu1 %v1101_v15  ;;  %v1081_v19 = vld [vmem:[#allocation4 + $0x4] sm:$0xf] }
 0x313   : > { %998 = vst.msk [vmem:[#allocation3 + $0x8] sm:$0xf] %vm971_vm2, %v992_v16  ;;  %2741 = vmatprep.subr.bf16.mxu1 %v3215_v59  ;;  %v1147_v23 = vsel %vm1096_vm4, %v1081_v19, 0 }
 0x314   : > { %v1019_v17 = vpop.permute.xlu0 %1018  ;;  %v1083_v36 = vld [vmem:[#allocation4 + $0xc] sm:$0xf] }
 0x315   : > { %1025 = vst.msk [vmem:[#allocation3 + $0x10] sm:$0xf] %vm971_vm2, %v1019_v17  ;;  %v1239_v40 = vsel %vm1096_vm4, %v1083_v36, 0 }
 0x316   : > { %v994_v18 = vpop.permute.xlu1 %993  ;;  %v1082_v28 = vld [vmem:[#allocation4 + $0x8] sm:$0xf] }
 0x317   : > { %999 = vst.msk [vmem:[#allocation3 + $0xc] sm:$0xf] %vm971_vm2, %v994_v18  ;;  %v1193_v32 = vsel %vm1096_vm4, %v1082_v28, 0 }
 0x318   : > { %v1055_v20 = vpop.permute.xlu0 %1054  ;;  %v1084_v22 = vld [vmem:[#allocation4 + $0x10] sm:$0xf] }
 0x319   : > { %1061 = vst.msk [vmem:[#allocation4 + $0x18] sm:$0xf] %vm971_vm2, %v1055_v20  ;;  %2738 = vmatmul.mubr.msk.bf16.vlgmr.msra.gmra.mrb[0].mxu1 %vm1096_vm4, %v1072_v21  ;;  %v1285_v24 = vsel %vm1096_vm4, %v1084_v22, 0 }
 0x31a   : > { %v1030_v25 = vpop.permute.xlu1 %1029  ;;  %2742 = vmatpush3.bf16.xpose.msra.mxu1 %v1147_v23  ;;  %2760 = vmatpush3.bf16.xpose.msra.mxu0 %v1285_v24  ;;  %v1074_v38 = vld [vmem:[#allocation3 + $0x8] sm:$0xf] }
 0x31b   : > { %1035 = vst.msk [vmem:[#allocation4 + $0x14] sm:$0xf] %vm971_vm2, %v1030_v25  ;;  %2743 = vmatprep.mubr.msk.bf16.mxu1 %vm3217_vm3, %v3215_v59  ;;  %2747 = vmatprep.subr.bf16.mxu1 %v3215_v59 }
 0x31c   : > { %v1046_v26 = vpop.permute.xlu0 %1045  ;;  %2771 = vmatprep.subr.bf16.mxu0 %v3215_v59  ;;  %v1076_v30 = vld [vmem:[#allocation3 + $0x10] sm:$0xf] }
 0x31d   : > { %1052 = vst.msk [vmem:[#allocation3 + $0x18] sm:$0xf] %vm971_vm2, %v1046_v26 }
 0x31e   : > { %v1021_v27 = vpop.permute.xlu1 %1020  ;;  %v1075_v43 = vld [vmem:[#allocation3 + $0xc] sm:$0xf] }
 0x31f   : > { %1026 = vst.msk [vmem:[#allocation3 + $0x14] sm:$0xf] %vm971_vm2, %v1021_v27 }
 0x320   : > { %v1086_v31 = vld [vmem:[#allocation4 + $0x18] sm:$0xf] }
 0x321   : > { %2744 = vmatmul.mubr.msk.bf16.vlgmr.msra.gmra.mrb[4].mxu1 %vm1096_vm4, %v1073_v29  ;;  %2762 = vmatmul.mubr.msk.bf16.vlgmr.msra.gmra.mrb[4].mxu0 %vm1096_vm4, %v1076_v30  ;;  %v1377_v33 = vsel %vm1096_vm4, %v1086_v31, 0 }
 0x322   : > { %v1057_v34 = vpop.permute.xlu1 %1056  ;;  %2748 = vmatpush3.bf16.xpose.msra.mxu1 %v1193_v32  ;;  %2772 = vmatpush3.bf16.xpose.msra.mxu0 %v1377_v33  ;;  %v1085_v42 = vld [vmem:[#allocation4 + $0x14] sm:$0xf] }
 0x323   : > { %1062 = vst.msk [vmem:[#allocation4 + $0x1c] sm:$0xf] %vm971_vm2, %v1057_v34  ;;  %2749 = vmatprep.mubr.msk.bf16.mxu1 %vm3217_vm3, %v3215_v59  ;;  %2773 = vmatprep.mubr.msk.bf16.mxu0 %vm3217_vm3, %v3215_v59  ;;  %v1331_v44 = vsel %vm1096_vm4, %v1085_v42, 0 }
 0x324   : > { %2753 = vmatprep.subr.bf16.mxu1 %v3215_v59  ;;  %2783 = vmatprep.subr.bf16.mxu0 %v3215_v59  ;;  %v1078_v39 = vld [vmem:[#allocation3 + $0x18] sm:$0xf] }
 0x326   : > { %v1048_v35 = vpop.permute.xlu1 %1047  ;;  %v1077_v46 = vld [vmem:[#allocation3 + $0x14] sm:$0xf] }
 0x327   : > { %1053 = vst.msk [vmem:[#allocation3 + $0x1c] sm:$0xf] %vm971_vm2, %v1048_v35 }
 0x329   : > { %2750 = vmatmul.mubr.msk.bf16.vlgmr.msra.gmra.mrb[8].mxu1 %vm1096_vm4, %v1074_v38  ;;  %2774 = vmatmul.mubr.msk.bf16.vlgmr.msra.gmra.mrb[8].mxu0 %vm1096_vm4, %v1078_v39 }
 0x32a   : > { %2754 = vmatpush3.bf16.xpose.msra.mxu1 %v1239_v40  ;;  %2784 = vmatpush3.bf16.msra.mxu0 %v1567_v41  ;;  %v1087_v45 = vld [vmem:[#allocation4 + $0x1c] sm:$0xf] }
 0x32b   : > { %2755 = vmatprep.mubr.msk.bf16.mxu1 %vm3217_vm3, %v3215_v59  ;;  %2765 = vmatprep.subr.bf16.mxu1 %v3215_v59  ;;  %v1423_v47 = vsel %vm1096_vm4, %v1087_v45, 0 }
 0x32c   : > { %2785 = vmatprep.mubr.msk.bf16.mxu0 %vm3217_vm3, %v3215_v59  ;;  %2795 = vmatprep.subr.bf16.mxu0 %v3215_v59 }
 0x32e   : > { %v1079_v49 = vld [vmem:[#allocation3 + $0x1c] sm:$0xf] }
 0x331   : > { %2756 = vmatmul.mubr.msk.bf16.vlgmr.msra.gmra.mrb[12].mxu1 %vm1096_vm4, %v1075_v43 }
 0x332   : > { %2766 = vmatpush3.bf16.xpose.msra.mxu1 %v1331_v44  ;;  %2767 = vmatprep.mubr.msk.bf16.mxu1 %vm3217_vm3, %v3215_v59 }
 0x333   : > { %2777 = vmatprep.subr.bf16.mxu1 %v3215_v59 }
 0x339   : > { %2768 = vmatmul.mubr.msk.bf16.vlgmr.msra.gmra.mrb[16].mxu1 %vm1096_vm4, %v1077_v46 }
 0x33a   : > { %2778 = vmatpush3.bf16.xpose.msra.mxu1 %v1423_v47  ;;  %2779 = vmatprep.mubr.msk.bf16.mxu1 %vm3217_vm3, %v3215_v59 }
 0x33b   : > { %2789 = vmatprep.subr.bf16.mxu1 %v3215_v59 }
 0x341   : > { %2780 = vmatmul.mubr.msk.bf16.vlgmr.msra.gmra.mrb[20].mxu1 %vm1096_vm4, %v1079_v49 }
 0x342   : > { %2790 = vmatpush3.bf16.msra.mxu1 %v1613_v50  ;;  %2791 = vmatprep.mubr.msk.bf16.mxu1 %vm3217_vm3, %v3215_v59 }
 0x343   : > { %2801 = vmatprep.subr.bf16.mxu1 %v3215_v59 }
 0x3ec   : > { %v1137_v51 = vpop.f32.mrb[0].mxu1 }
 0x3ed   : > { %v2739_v52 = vpop.f32.mrb[1].mxu1  ;;  %v1466_v53 = vsel %vm1465_vm6, %v1137_v51, -inf }
 0x3ee   : > { %1467 = vmax.xlane.f32.xlu0 %v1466_v53  ;;  %v1140_v54 = vpop.f32.mrb[2].mxu1 }
 0x3ef   : > { %v2740_v55 = vpop.f32.mrb[3].mxu1 }
 0x3f4   : > { %v1183_v56 = vpop.f32.mrb[4].mxu1  ;;  %v1321_v57 = vpop.f32.mrb[4].mxu0 }
 0x3f5   : > { %v2745_v58 = vpop.f32.mrb[5].mxu1  ;;  %v2763_v60 = vpop.f32.mrb[5].mxu0  ;;  %v1469_v61 = vsel %vm1465_vm6, %v1183_v56, -inf  ;;  %v1478_v20 = vsel %vm1465_vm6, %v1321_v57, -inf }
 0x3f6   : > { %v1324_v62 = vpop.f32.mrb[6].mxu0  ;;  %1470 = vmax.xlane.f32.xlu1 %v1469_v61  ;;  %v1186_v63 = vpop.f32.mrb[6].mxu1 }
 0x3f7   : > { %v2746_v0 = vpop.f32.mrb[7].mxu1  ;;  %v2764_v1 = vpop.f32.mrb[7].mxu0 }
 0x3fc   : > { %v1229_v2 = vpop.f32.mrb[8].mxu1  ;;  %v1413_v4 = vpop.f32.mrb[8].mxu0 }
 0x3fd   : > { %v2751_v5 = vpop.f32.mrb[9].mxu1  ;;  %v2775_v7 = vpop.f32.mrb[9].mxu0  ;;  %v1472_v8 = vsel %vm1465_vm6, %v1229_v2, -inf  ;;  %v1484_v23 = vsel %vm1465_vm6, %v1413_v4, -inf }
 0x3fe   : > { %v1416_v9 = vpop.f32.mrb[10].mxu0  ;;  %1473 = vmax.xlane.f32.xlu0 %v1472_v8  ;;  %v1232_v10 = vpop.f32.mrb[10].mxu1 }
 0x3ff   : > { %v2752_v13 = vpop.f32.mrb[11].mxu1  ;;  %v2776_v14 = vpop.f32.mrb[11].mxu0 }
 0x404   : > { %v3646_v15 = vpop.f32.mrb[12].mxu1 }
 0x405   : > { %v2757_v16 = vpop.f32.mrb[13].mxu1  ;;  %v1475_v17 = vsel %vm1465_vm6, %v3646_v15, -inf }
 0x406   : > { %1476 = vmax.xlane.f32.xlu0 %v1475_v17  ;;  %v1278_v18 = vpop.f32.mrb[14].mxu1 }
 0x407   : > { %v2758_v19 = vpop.f32.mrb[15].mxu1 }
 0x40a   : > { %1479 = vmax.xlane.f32.xlu0 %v1478_v20 }
 0x40c   : > { %v1367_v21 = vpop.f32.mrb[16].mxu1 }
 0x40d   : > { %v2769_v22 = vpop.f32.mrb[17].mxu1  ;;  %v1481_v24 = vsel %vm1465_vm6, %v1367_v21, -inf }
 0x40e   : > { %1485 = vmax.xlane.f32.xlu0 %v1484_v23  ;;  %1482 = vmax.xlane.f32.xlu1 %v1481_v24  ;;  %v1370_v25 = vpop.f32.mrb[18].mxu1 }
 0x40f   : > { %v2770_v26 = vpop.f32.mrb[19].mxu1 }
 0x414   : > { %v1459_v27 = vpop.f32.mrb[20].mxu1 }
 0x415   : > { %v2781_v28 = vpop.f32.mrb[21].mxu1  ;;  %v1487_v29 = vsel %vm1465_vm6, %v1459_v27, -inf }
 0x416   : > { %1488 = vmax.xlane.f32.xlu1 %v1487_v29  ;;  %v1462_v30 = vpop.f32.mrb[22].mxu1 }
 0x417   : > { %v2782_v31 = vpop.f32.mrb[23].mxu1 }
 0x47b   : > { %v1468_v32 = vpop.xlane.xlu0 %1467 }
 0x47c   : > { %v1490_v33 = vsub.f32 %v1137_v51, %v1468_v32 }
 0x47e   : > { %v1498_v34 = vmul.f32 1.442695, %v1490_v33 }
 0x480   : > { %3015 = vpow2.f32 %v1498_v34 }
 0x483   : > { %v1471_v35 = vpop.xlane.xlu1 %1470 }
 0x484   : > { %v1491_v36 = vsub.f32 %v1183_v56, %v1471_v35 }
 0x486   : > { %v1500_v37 = vmul.f32 1.442695, %v1491_v36 }
 0x488   : > { %3017 = vpow2.f32 %v1500_v37 }
 0x48a   : > { %v3016_v38 = vpop.eup %3015 }
 0x48b   : > { %v1514_v39 = vsel %vm1465_vm6, %v3016_v38, 0.0  ;;  %v1474_v40 = vpop.xlane.xlu0 %1473 }
 0x48c   : > { %1515 = vadd.xlane.f32.xlu0 %v1514_v39  ;;  %v1492_v46 = vsub.f32 %v1229_v2, %v1474_v40 }
 0x48e   : > { %v1502_v50 = vmul.f32 1.442695, %v1492_v46 }
 0x492   : > { %v3655_v41 = vpop.eup %3017 }
 0x493   : > { %v1477_v42 = vpop.xlane.xlu0 %1476  ;;  %v1517_v43 = vsel %vm1465_vm6, %v3655_v41, 0.0 }
 0x494   : > { %1518 = vadd.xlane.f32.xlu1 %v1517_v43  ;;  %v1493_v58 = vsub.f32 %v3646_v15, %v1477_v42 }
 0x496   : > { %v1504_v61 = vmul.f32 1.442695, %v1493_v58 }
 0x497   : > { %v1480_v44 = vpop.xlane.xlu0 %1479 }
 0x498   : > { %v1494_v45 = vsub.f32 %v1321_v57, %v1480_v44 }
 0x49a   : > { %v1506_v47 = vmul.f32 1.442695, %v1494_v45 }
 0x49b   : > { %v1486_v48 = vpop.xlane.xlu0 %1485  ;;  %v1483_v60 = vpop.xlane.xlu1 %1482 }
 0x49c   : > { %3019 = vpow2.f32 %v1506_v47  ;;  %v1496_v49 = vsub.f32 %v1413_v4, %v1486_v48  ;;  %v1495_v62 = vsub.f32 %v1367_v21, %v1483_v60 }
 0x49e   : > { %v1510_v51 = vmul.f32 1.442695, %v1496_v49  ;;  %v1508_v0 = vmul.f32 1.442695, %v1495_v62 }
 0x4a0   : > { %3021 = vpow2.f32 %v1510_v51 }
 0x4a1   : > { %3023 = vpow2.f32 %v1502_v50 }
 0x4a2   : > { %3025 = vpow2.f32 %v1504_v61 }
 0x4a3   : > { %v1489_v63 = vpop.xlane.xlu1 %1488  ;;  %3027 = vpow2.f32 %v1508_v0 }
 0x4a4   : > { %v1497_v1 = vsub.f32 %v1459_v27, %v1489_v63 }
 0x4a5   : > { %1011 = vrot.lane.b32.xlu1 %v3564_v6, %s3220_s26 }
 0x4a6   : > { %v3661_v52 = vpop.eup %3019  ;;  %v1512_v2 = vmul.f32 1.442695, %v1497_v1 }
 0x4a7   : > { %v1526_v53 = vsel %vm1465_vm6, %v3661_v52, 0.0 }
 0x4a8   : > { %1527 = vadd.xlane.f32.xlu0 %v1526_v53  ;;  %3029 = vpow2.f32 %v1512_v2 }
 0x4a9   : > { %1036 = vrot.lane.b32.xlu1 %v3559_v3, %s3221_s11 }
 0x4aa   : > { %v3667_v54 = vpop.eup %3021 }
 0x4ab   : > { %v1532_v55 = vsel %vm1465_vm6, %v3667_v54, 0.0  ;;  %v3024_v56 = vpop.eup %3023 }
 0x4ac   : > { %1533 = vadd.xlane.f32.xlu0 %v1532_v55  ;;  %v1520_v57 = vsel %vm1465_vm6, %v3024_v56, 0.0  ;;  %v3679_v4 = vpop.eup %3025 }
 0x4ad   : > { %1038 = vrot.lane.b32.xlu1 %v3564_v6, %s3221_s11  ;;  %v1523_v5 = vsel %vm1465_vm6, %v3679_v4, 0.0  ;;  %v3683_v7 = vpop.eup %3027 }
 0x4ae   : > { %v1529_v8 = vsel %vm1465_vm6, %v3683_v7, 0.0 }
 0x4b0   : > { %1521 = vadd.xlane.f32.xlu0 %v1520_v57 }
 0x4b2   : > { %v3687_v9 = vpop.eup %3029 }
 0x4b3   : > { %v1535_v10 = vsel %vm1465_vm6, %v3687_v9, 0.0 }
 0x4c6   : > { %1009 = vrot.lane.b32.xlu0 %v3559_v3, %s3220_s26 }
 0x4ca   : > { %1063 = vrot.lane.b32.xlu0 %v3559_v3, %s3223_s8 }
 0x4d1   : > { %1524 = vadd.xlane.f32.xlu1 %v1523_v5 }
 0x4d5   : > { %1530 = vadd.xlane.f32.xlu1 %v1529_v8 }
 0x4d9   : > { %1536 = vadd.xlane.f32.xlu1 %v1535_v10 }
 0x4ea   : > { %1065 = vrot.lane.b32.xlu1 %v3564_v6, %s3223_s8 }
 0x519   : > { %v1516_v3 = vpop.xlane.xlu0 %1515 }
 0x51a   : > { %3031 = vrcp.f32 %v1516_v3 }
 0x521   : > { %v1519_v13 = vpop.xlane.xlu1 %1518 }
 0x522   : > { %3033 = vrcp.f32 %v1519_v13 }
 0x524   : > { %v3032_v14 = vpop.eup %3031 }
 0x525   : > { %v1546_v15 = vmul.f32 %v3032_v14, %v3016_v38  ;;  %v1012_v16 = vpop.permute.xlu1 %1011 }
 0x526   : > { %1017 = vst.msk [vmem:[#allocation5 + $0xc] sm:$0xf] %vm971_vm2, %v1012_v16 }
 0x527   : > { %v1554_v17 = vpack.c.bf16 %v1546_v15, %v1546_v15 }
 0x529   : > { %2786 = vmatmul.mubr.msk.bf16.vlgmr.msra.gmra.mrb[12].mxu0 %vm1465_vm6, %v1554_v17  ;;  %v1037_v18 = vpop.permute.xlu1 %1036 }
 0x52a   : > { %1043 = vst.msk [vmem:[#allocation5 + $0x10] sm:$0xf] %vm971_vm2, %v1037_v18  ;;  %2797 = vmatprep.mubr.msk.bf16.mxu0 %vm3217_vm3, %v3215_v59 }
 0x52c   : > { %v3034_v19 = vpop.eup %3033 }
 0x52d   : > { %v1547_v6 = vmul.f32 %v3034_v19, %v3655_v41  ;;  %v1039_v20 = vpop.permute.xlu1 %1038  ;;  %v1091_v21 = vld [vmem:[#allocation5 + $0xc] sm:$0xf] }
 0x52e   : > { %1044 = vst.msk [vmem:[#allocation5 + $0x14] sm:$0xf] %vm971_vm2, %v1039_v20  ;;  %v1705_v23 = vsel %vm1565_vm5, %v1091_v21, 0  ;;  %v3007_v20 = vld [vmem:[%s3978_s2] sm:$0xff]   ;;  %v3008_v21 = vld [vmem:[%s3978_s2 + $0x8] sm:$0xff]  }
 0x52f   : > { %v1555_v22 = vpack.c.bf16 %v1547_v6, %v1547_v6 }
 0x531   : > { %2792 = vmatmul.mubr.msk.bf16.vlgmr.msra.gmra.mrb[24].mxu1 %vm1465_vm6, %v1555_v22  ;;  %v1092_v34 = vld [vmem:[#allocation5 + $0x10] sm:$0xf] }
 0x532   : > { %2802 = vmatpush3.bf16.msra.mxu1 %v1705_v23  ;;  %2803 = vmatprep.mubr.msk.bf16.mxu1 %vm3217_vm3, %v3215_v59  ;;  %v1751_v36 = vsel %vm1565_vm5, %v1092_v34, 0 }
 0x533   : > { %2813 = vmatprep.subr.bf16.mxu1 %v3215_v59 }
 0x535   : > { %v1528_v24 = vpop.xlane.xlu0 %1527  ;;  %v1093_v50 = vld [vmem:[#allocation5 + $0x14] sm:$0xf] }
 0x536   : > { %v1797_v53 = vsel %vm1565_vm5, %v1093_v50, 0 }
 0x539   : > { %v1534_v25 = vpop.xlane.xlu0 %1533 }
 0x53d   : > { %v1522_v26 = vpop.xlane.xlu0 %1521 }
 0x53e   : > { %3035 = vrcp.f32 %v1522_v26  ;;  %v3009_v26 = vld [vmem:[%s3978_s2 + $0x10] sm:$0xff]  }
 0x53f   : > { %3037 = vrcp.f32 %v1528_v24 }
 0x540   : > { %3039 = vrcp.f32 %v1534_v25 }
 0x541   : > { %v1010_v27 = vpop.permute.xlu0 %1009 }
 0x542   : > { %1016 = vst.msk [vmem:[#allocation5 + $0x8] sm:$0xf] %vm971_vm2, %v1010_v27  ;;  %v3010_v27 = vld [vmem:[%s3978_s2 + $0x18] sm:$0xff]  }
 0x545   : > { %v1064_v28 = vpop.permute.xlu0 %1063 }
 0x546   : > { %1070 = vst.msk [vmem:[#allocation5 + $0x18] sm:$0xf] %vm971_vm2, %v1064_v28 }
 0x548   : > { %v3036_v29 = vpop.eup %3035 }
 0x549   : > { %v1548_v30 = vmul.f32 %v3036_v29, %v3024_v56  ;;  %v1090_v31 = vld [vmem:[#allocation5 + $0x8] sm:$0xf]  ;;  %v3038_v35 = vpop.eup %3037 }
 0x54a   : > { %v1659_v32 = vsel %vm1565_vm5, %v1090_v31, 0  ;;  %v1550_v37 = vmul.f32 %v3038_v35, %v3661_v52  ;;  %v3040_v40 = vpop.eup %3039 }
 0x54b   : > { %2796 = vmatpush3.bf16.msra.mxu0 %v1659_v32  ;;  %v1556_v33 = vpack.c.bf16 %v1548_v30, %v1548_v30  ;;  %v1552_v42 = vmul.f32 %v3040_v40, %v3667_v54 }
 0x54c   : > { %2807 = vmatprep.subr.bf16.mxu0 %v3215_v59  ;;  %v1558_v39 = vpack.c.bf16 %v1550_v37, %v1550_v37 }
 0x54d   : > { %v1094_v38 = vld [vmem:[#allocation5 + $0x18] sm:$0xf]  ;;  %v1560_v43 = vpack.c.bf16 %v1552_v42, %v1552_v42 }
 0x54e   : > { %2798 = vmatmul.mubr.msk.bf16.vlgmr.msra.gmra.mrb[16].mxu0 %vm1465_vm6, %v1556_v33  ;;  %v1843_v41 = vsel %vm1565_vm5, %v1094_v38, 0 }
 0x54f   : > { %2808 = vmatpush3.bf16.msra.mxu0 %v1751_v36  ;;  %2809 = vmatprep.mubr.msk.bf16.mxu0 %vm3217_vm3, %v3215_v59 }
 0x550   : > { %2819 = vmatprep.subr.bf16.mxu0 %v3215_v59 }
 0x556   : > { %2810 = vmatmul.mubr.msk.bf16.vlgmr.msra.gmra.mrb[20].mxu0 %vm1465_vm6, %v1558_v39 }
 0x557   : > { %2820 = vmatpush3.bf16.msra.mxu0 %v1843_v41  ;;  %2821 = vmatprep.mubr.msk.bf16.mxu0 %vm3217_vm3, %v3215_v59 }
 0x558   : > { %2831 = vmatprep.subr.bf16.mxu0 %v3215_v59 }
 0x55e   : > { %2822 = vmatmul.mubr.msk.bf16.vlgmr.msra.gmra.mrb[24].mxu0 %vm1465_vm6, %v1560_v43  ;;  %v1525_v44 = vpop.xlane.xlu1 %1524 }
 0x55f   : > { %3041 = vrcp.f32 %v1525_v44  ;;  %2839 = vmatprep.mubr.msk.bf16.mxu0 %vm3217_vm3, %v3215_v59  ;;  %2832 = vmatpush3.bf16.msra.mxu0 %v3007_v20  ;;  %v2638_v44 = vld [vmem:[%s750_s17] ss:$0 sm:$0xff] }
 0x560   : > { %2833 = vmatprep.subr.bf16.mxu0 %v3215_v59 }
 0x562   : > { %v1531_v45 = vpop.xlane.xlu1 %1530 }
 0x563   : > { %3043 = vrcp.f32 %v1531_v45  ;;  %2834 = vmatpush3.bf16.msra.mxu0 %v3008_v21 }
 0x564   : > { %2835 = vmatprep.subr.bf16.mxu0 %v3215_v59 }
 0x566   : > { %v1537_v46 = vpop.xlane.xlu1 %1536 }
 0x567   : > { %3045 = vrcp.f32 %v1537_v46  ;;  %2836 = vmatpush3.bf16.msra.mxu0 %v3009_v26 }
 0x568   : > { %2837 = vmatprep.subr.bf16.mxu0 %v3215_v59 }
 0x569   : > { %v3042_v47 = vpop.eup %3041 }
 0x56a   : > { %v1549_v48 = vmul.f32 %v3042_v47, %v3679_v4  ;;  %v1066_v49 = vpop.permute.xlu1 %1065 }
 0x56b   : > { %1071 = vst.msk [vmem:[#allocation5 + $0x1c] sm:$0xf] %vm971_vm2, %v1066_v49  ;;  %2838 = vmatpush3.bf16.msra.mxu0 %v3010_v27 }
 0x56c   : > { %v1557_v51 = vpack.c.bf16 %v1549_v48, %v1549_v48  ;;  %v2644_v48 = vld [vmem:[%s782_s19] ss:$0 sm:$0xff] }
 0x56d   : > { %v3044_v52 = vpop.eup %3043 }
 0x56e   : > { %2804 = vmatmul.mubr.msk.bf16.vlgmr.msra.gmra.mrb[28].mxu1 %vm1465_vm6, %v1557_v51  ;;  %v1551_v54 = vmul.f32 %v3044_v52, %v3683_v7 }
 0x56f   : > { %2814 = vmatpush3.bf16.msra.mxu1 %v1797_v53  ;;  %2815 = vmatprep.mubr.msk.bf16.mxu1 %vm3217_vm3, %v3215_v59 }
 0x570   : > { %2825 = vmatprep.subr.bf16.mxu1 %v3215_v59  ;;  %v1559_v56 = vpack.c.bf16 %v1551_v54, %v1551_v54 }
 0x571   : > { %v3046_v57 = vpop.eup %3045 }
 0x572   : > { %v1095_v55 = vld [vmem:[#allocation5 + $0x1c] sm:$0xf]  ;;  %v1553_v60 = vmul.f32 %v3046_v57, %v3687_v9 }
 0x573   : > { %v1889_v58 = vsel %vm1565_vm5, %v1095_v55, 0 }
 0x574   : > { %v1561_v61 = vpack.c.bf16 %v1553_v60, %v1553_v60 }
 0x576   : > { %2816 = vmatmul.mubr.msk.bf16.vlgmr.msra.gmra.mrb[32].mxu1 %vm1465_vm6, %v1559_v56 }
 0x577   : > { %2826 = vmatpush3.bf16.msra.mxu1 %v1889_v58  ;;  %2827 = vmatprep.mubr.msk.bf16.mxu1 %vm3217_vm3, %v3215_v59 }
 0x57e   : > { %2828 = vmatmul.mubr.msk.bf16.vlgmr.msra.gmra.mrb[36].mxu1 %vm1465_vm6, %v1561_v61 }
 0x5fc   : > { %v1603_v62 = vpop.f32.mrb[12].mxu0 }
 0x5fd   : > { %1931 = vst.msk [vmem:[#allocation6] sm:$0xff] %vm1096_vm4, %v1603_v62  ;;  %v2787_v63 = vpop.f32.mrb[13].mxu0 }
 0x5fe   : > { %v1606_v0 = vpop.f32.mrb[14].mxu0 }
 0x5ff   : > { %v2788_v1 = vpop.f32.mrb[15].mxu0 }
 0x604   : > { %v1649_v2 = vpop.f32.mrb[24].mxu1 }
 0x605   : > { %1932 = vst.msk [vmem:[#allocation6 + $0x8] sm:$0xff] %vm1096_vm4, %v1649_v2  ;;  %v2793_v4 = vpop.f32.mrb[25].mxu1 }
 0x606   : > { %v1652_v5 = vpop.f32.mrb[26].mxu1 }
 0x607   : > { %v2794_v7 = vpop.f32.mrb[27].mxu1 }
 0x621   : > { %v1695_v8 = vpop.f32.mrb[16].mxu0 }
 0x622   : > { %1935 = vrot.lane.b32.xlu0 %v1695_v8, %s3222_s27  ;;  %v2799_v9 = vpop.f32.mrb[17].mxu0 }
 0x623   : > { %v1698_v10 = vpop.f32.mrb[18].mxu0 }
 0x624   : > { %v2800_v3 = vpop.f32.mrb[19].mxu0 }
 0x629   : > { %v1787_v13 = vpop.f32.mrb[20].mxu0 }
 0x62a   : > { %1946 = vrot.lane.b32.xlu0 %v1787_v13, %s3219_s10  ;;  %v2811_v14 = vpop.f32.mrb[21].mxu0 }
 0x62b   : > { %v1790_v15 = vpop.f32.mrb[22].mxu0  ;;  %v2645_v14 = vld [vmem:[%s759_s4] ss:$0 sm:$0xff] }
 0x62c   : > { %v2812_v16 = vpop.f32.mrb[23].mxu0 }
 0x631   : > { %v1879_v17 = vpop.f32.mrb[24].mxu0 }
 0x632   : > { %1957 = vrot.lane.b32.xlu0 %v1879_v17, %s3218_s18  ;;  %v2823_v18 = vpop.f32.mrb[25].mxu0 }
 0x633   : > { %v1882_v19 = vpop.f32.mrb[26].mxu0  ;;  %v2646_v18 = vld [vmem:[%s3983_s25] ss:$0 sm:$0xff] }
 0x634   : > { %v2824_v6 = vpop.f32.mrb[27].mxu0 }
 0x641   : > { %v1741_v22 = vpop.f32.mrb[28].mxu1 }
 0x642   : > { %1937 = vrot.lane.b32.xlu1 %v1741_v22, %s3222_s27  ;;  %v2805_v23 = vpop.f32.mrb[29].mxu1 }
 0x643   : > { %v1744_v24 = vpop.f32.mrb[30].mxu1 }
 0x644   : > { %v2806_v25 = vpop.f32.mrb[31].mxu1 }
 0x649   : > { %v1833_v28 = vpop.f32.mrb[32].mxu1 }
 0x64a   : > { %1948 = vrot.lane.b32.xlu1 %v1833_v28, %s3219_s10  ;;  %v2817_v29 = vpop.f32.mrb[33].mxu1 }
 0x64b   : > { %v1836_v30 = vpop.f32.mrb[34].mxu1 }
 0x64c   : > { %v2818_v31 = vpop.f32.mrb[35].mxu1 }
 0x651   : > { %v1925_v32 = vpop.f32.mrb[36].mxu1 }
 0x652   : > { %1959 = vrot.lane.b32.xlu1 %v1925_v32, %s3218_s18  ;;  %v2829_v33 = vpop.f32.mrb[37].mxu1 }
 0x653   : > { %v1928_v34 = vpop.f32.mrb[38].mxu1 }
 0x654   : > { %v2830_v35 = vpop.f32.mrb[39].mxu1 }
 0x694   : > { %v1936_v36 = vpop.permute.xlu0 %1935 }
 0x695   : > { %1942 = vst.msk [vmem:[#allocation6] sm:$0xff] %vm1941_vm7, %v1936_v36 }
 0x69c   : > { %v1947_v37 = vpop.permute.xlu0 %1946 }
 0x69d   : > { %1953 = vst.msk [vmem:[#allocation6] sm:$0xff] %vm1952_vm8, %v1947_v37 }
 0x6a4   : > { %v1958_v59 = vpop.permute.xlu0 %1957 }
 0x6a5   : > { %1964 = vst.msk [vmem:[#allocation6] sm:$0xff] %vm1963_vm9, %v1958_v59 }
 0x6ac   : > { %v1966_v41 = vld [vmem:[#allocation6] sm:$0xff] }
 0x6b4   : > { %v1938_v38 = vpop.permute.xlu1 %1937 }
 0x6b5   : > { %1943 = vst.msk [vmem:[#allocation6 + $0x8] sm:$0xff] %vm1941_vm7, %v1938_v38 }
 0x6bc   : > { %v1949_v39 = vpop.permute.xlu1 %1948 }
 0x6bd   : > { %1954 = vst.msk [vmem:[#allocation6 + $0x8] sm:$0xff] %vm1952_vm8, %v1949_v39 }
 0x6c4   : > { %v1960_v40 = vpop.permute.xlu1 %1959 }
 0x6c5   : > { %1965 = vst.msk [vmem:[#allocation6 + $0x8] sm:$0xff] %vm1963_vm9, %v1960_v40 }
 0x6cc   : > { %v1967_v42 = vld [vmem:[#allocation6 + $0x8] sm:$0xff] }
 0x6cd   : > { %v1968_v43 = vpack.c.bf16 %v1967_v42, %v1966_v41 }
 0x6cf   : > { %2840 = vmatmul.mubr.msk.bf16.vlgmr.msra.gmra.mrb[28].mxu0 %vm809_vm1, %v1968_v43 }
 0x7a2   : > { %v2045_v45 = vpop.f32.mrb[28].mxu0 }
 0x7a3   : > { %v2046_v46 = vadd.f32 %v2638_v44, %v2045_v45  ;;  %v2841_v47 = vpop.f32.mrb[29].mxu0 }
 0x7a4   : > { %v2048_v49 = vpop.f32.mrb[30].mxu0 }
 0x7a5   : > { %v2052_v50 = vadd.f32 %v2046_v46, %v3524_v11  ;;  %v2049_v51 = vadd.f32 %v2638_v44, %v2048_v49  ;;  %v2842_v52 = vpop.f32.mrb[31].mxu0 }
 0x7a7   : > { %v2061_v53 = vadd.f32 %v2644_v48, %v2052_v50  ;;  %v2053_v54 = vadd.f32 %v2049_v51, %v3527_v12  ;;  %v2065_v55 = vsel %vm809_vm1, %v2052_v50, 0.0 }
 0x7a8   : > { %2066 = vadd.xlane.f32.xlu0 %v2065_v55 }
 0x7a9   : > { %2063 = vst.msk [vmem:[%s3521_s15] sm:$0xff] %vm809_vm1, %v2061_v53  ;;  %v2062_v56 = vadd.f32 %v2644_v48, %v2053_v54  ;;  %v2068_v57 = vsel %vm809_vm1, %v2053_v54, 0.0 }
 0x7aa   : > { %2069 = vadd.xlane.f32.xlu1 %v2068_v57 }
 0x7ab   : > { %2064 = vst.msk [vmem:[%s3521_s15 + $0x8] sm:$0xff] %vm809_vm1, %v2062_v56 }
 0x835   : > { %v2067_v58 = vpop.xlane.xlu0 %2066 }
 0x836   : > { %v2071_v60 = vmul.f32 0.015625, %v2067_v58 }
 0x837   : > { %v2070_v61 = vpop.xlane.xlu1 %2069 }
 0x838   : > { %v2073_v11 = vsub.f32 %v2052_v50, %v2071_v60  ;;  %v2072_v62 = vmul.f32 0.015625, %v2070_v61 }
 0x83a   : > { %v2074_v63 = vsub.f32 %v2053_v54, %v2072_v62  ;;  %v2075_v0 = vmul.f32 %v2073_v11, %v2073_v11 }
 0x83c   : > { %v2077_v12 = vsel %vm809_vm1, %v2075_v0, 0.0  ;;  %v2076_v1 = vmul.f32 %v2074_v63, %v2074_v63 }
 0x83d   : > { %2078 = vadd.xlane.f32.xlu0 %v2077_v12 }
 0x83e   : > { %v2080_v2 = vsel %vm809_vm1, %v2076_v1, 0.0 }
 0x841   : > { %2081 = vadd.xlane.f32.xlu0 %v2080_v2 }
 0x8ca   : > { %v2079_v4 = vpop.xlane.xlu0 %2078 }
 0x8cb   : > { %v2083_v5 = vmul.f32 0.015625, %v2079_v4 }
 0x8cd   : > { %v2085_v7 = vadd.f32 1e-05, %v2083_v5 }
 0x8ce   : > { %v2082_v8 = vpop.xlane.xlu0 %2081 }
 0x8cf   : > { %3047 = vrsqrt.f32 %v2085_v7  ;;  %v2084_v9 = vmul.f32 0.015625, %v2082_v8 }
 0x8d1   : > { %v2086_v10 = vadd.f32 1e-05, %v2084_v9 }
 0x8d3   : > { %3049 = vrsqrt.f32 %v2086_v10 }
 0x8d9   : > { %v3048_v3 = vpop.eup %3047 }
 0x8da   : > { %v2089_v13 = vmul.f32 %v3048_v3, %v2073_v11 }
 0x8dc   : > { %v2098_v16 = vmul.f32 %v2645_v14, %v2089_v13 }
 0x8dd   : > { %v3050_v15 = vpop.eup %3049 }
 0x8de   : > { %v2090_v17 = vmul.f32 %v3050_v15, %v2074_v63  ;;  %v2107_v6 = vadd.f32 %v2646_v18, %v2098_v16 }
 0x8e0   : > { %v2099_v19 = vmul.f32 %v2645_v14, %v2090_v17 }
 0x8e2   : > { %v2108_v20 = vadd.f32 %v2646_v18, %v2099_v19 }
 0x8e4   : > { %v2109_v21 = vpack.c.bf16 %v2108_v20, %v2107_v6 }
 0x8e6   : > { %2110 = vst.msk [vmem:[#allocation7] sm:$0xff] %vm809_vm1, %v2109_v21 }
 0x8e7 PF: > { %v3051_v22 = vld [vmem:[%s3513_s6] sm:$0xff]   ;;  %v3224_v23 = vmov 0.0   ;;  %v3052_v24 = vld [vmem:[%s3513_s6 + $0x8] sm:$0xff]   ;;  %vm3225_vm10 = vmmov 0   ;;  %v3053_v25 = vld [vmem:[%s3513_s6 + $0x10] sm:$0xff]   ;;  %vm2151_vm11 = vcmask 523264  }
 0x8e8   : > { %2843 = vmatprep.subr.bf16.mxu0 %v3224_v23  ;;  %2855 = vmatprep.subr.bf16.mxu1 %v3224_v23  ;;  %v3054_v26 = vld [vmem:[%s3513_s6 + $0x18] sm:$0xff]   ;;  %v3055_v28 = vld [vmem:[%s3508_s1] sm:$0xff]   ;;  %v3056_v29 = vld [vmem:[%s3508_s1 + $0x8] sm:$0xff]   ;;  %p2664_p5 = scmp.ne.s32.totalorder %s3187_s22, 1 }
 0x8e9   : > { %2844 = vmatpush3.bf16.msra.mxu0 %v3051_v22  ;;  %2851 = vmatprep.mubr.msk.bf16.mxu0 %vm3225_vm10, %v3224_v23  ;;  %v3057_v30 = vld [vmem:[%s3508_s1 + $0x10] sm:$0xff]   ;;  %v3058_v31 = vld [vmem:[%s3508_s1 + $0x18] sm:$0xff]   ;;  %v3059_v32 = vld [vmem:[%s3508_s1 + $0x20] sm:$0xff]  }
 0x8ea   : > { %2845 = vmatprep.subr.bf16.mxu0 %v3224_v23  ;;  %2871 = vmatprep.mubr.msk.bf16.mxu1 %vm3225_vm10, %v3224_v23  ;;  %v3060_v33 = vld [vmem:[%s3508_s1 + $0x28] sm:$0xff]   ;;  %v3061_v34 = vld [vmem:[%s3508_s1 + $0x30] sm:$0xff]   ;;  %v3062_v35 = vld [vmem:[%s3508_s1 + $0x38] sm:$0xff]   ;;  %s2679_s1 = sshll.u32 %s3191_s23, 4 }
 0x8eb   : > { %2856 = vmatpush3.bf16.msra.mxu1 %v3055_v28  ;;  %v2647_v36 = vld [vmem:[%s769_s21] ss:$0 sm:$0xff]  ;;  %s2319_s13 = scalar_lea.vmem [#allocation2], %s2679_s1 }
 0x8ec   : > { %2857 = vmatprep.subr.bf16.mxu1 %v3224_v23  ;;  %v2320_v55 = vld [vmem:[%s2319_s13] sm:$0xff]  ;;  %v2321_v57 = vld [vmem:[%s2319_s13 + $0x8] sm:$0xff] }
 0x8ed   : > { %2846 = vmatpush3.bf16.msra.mxu0 %v3052_v24  ;;  %v2111_v27 = vld [vmem:[#allocation7] sm:$0xff] }
 0x8ee   : > { %2847 = vmatprep.subr.bf16.mxu0 %v3224_v23 }
 0x8ef   : > { %2858 = vmatpush3.bf16.msra.mxu1 %v3056_v29 }
 0x8f0   : > { %2859 = vmatprep.subr.bf16.mxu1 %v3224_v23 }
 0x8f1   : > { %2848 = vmatpush3.bf16.msra.mxu0 %v3053_v25 }
 0x8f2   : > { %2849 = vmatprep.subr.bf16.mxu0 %v3224_v23 }
 0x8f3   : > { %2860 = vmatpush3.bf16.msra.mxu1 %v3057_v30 }
 0x8f4   : > { %2861 = vmatprep.subr.bf16.mxu1 %v3224_v23 }
 0x8f5   : > { %2850 = vmatpush3.bf16.msra.mxu0 %v3054_v26 }
 0x8f7   : > { %2862 = vmatpush3.bf16.msra.mxu1 %v3058_v31 }
 0x8f8   : > { %2852 = vmatmul.mubr.msk.bf16.vlgmr.msra.gmra.mrb[0].mxu0 %vm2151_vm11, %v2111_v27  ;;  %2863 = vmatprep.subr.bf16.mxu1 %v3224_v23 }
 0x8fb   : > { %2864 = vmatpush3.bf16.msra.mxu1 %v3059_v32 }
 0x8fc   : > { %2865 = vmatprep.subr.bf16.mxu1 %v3224_v23 }
 0x8ff   : > { %2866 = vmatpush3.bf16.msra.mxu1 %v3060_v33 }
 0x900   : > { %2867 = vmatprep.subr.bf16.mxu1 %v3224_v23 }
 0x903   : > { %2868 = vmatpush3.bf16.msra.mxu1 %v3061_v34 }
 0x904   : > { %2869 = vmatprep.subr.bf16.mxu1 %v3224_v23 }
 0x907   : > { %2870 = vmatpush3.bf16.msra.mxu1 %v3062_v35 }
 0x9cb   : > { %v2189_v37 = vpop.f32.mrb[0].mxu0 }
 0x9cc   : > { %v2190_v59 = vadd.f32 %v2647_v36, %v2189_v37  ;;  %v2853_v38 = vpop.f32.mrb[1].mxu0 }
 0x9cd   : > { %v2192_v39 = vpop.f32.mrb[2].mxu0 }
 0x9ce   : > { %v2653_v40 = vmul.f32 -1.702, %v2190_v59  ;;  %v2193_v41 = vadd.f32 %v2647_v36, %v2192_v39  ;;  %v2854_v42 = vpop.f32.mrb[3].mxu0 }
 0x9d0   : > { %v2200_v43 = vmul.f32 1.442695, %v2653_v40  ;;  %v2654_v44 = vmul.f32 -1.702, %v2193_v41 }
 0x9d2   : > { %3063 = vpow2.f32 %v2200_v43  ;;  %v2202_v45 = vmul.f32 1.442695, %v2654_v44 }
 0x9d4   : > { %3065 = vpow2.f32 %v2202_v45 }
 0x9dc   : > { %v3064_v46 = vpop.eup %3063 }
 0x9dd   : > { %v2204_v47 = vadd.f32 1.0, %v3064_v46 }
 0x9de   : > { %v3066_v48 = vpop.eup %3065 }
 0x9df   : > { %3067 = vrcp.f32 %v2204_v47  ;;  %v2205_v49 = vadd.f32 1.0, %v3066_v48 }
 0x9e1   : > { %3069 = vrcp.f32 %v2205_v49 }
 0x9e9   : > { %v3068_v50 = vpop.eup %3067 }
 0x9ea   : > { %v2210_v52 = vmul.f32 %v3068_v50, %v2190_v59 }
 0x9eb   : > { %v3070_v51 = vpop.eup %3069 }
 0x9ec   : > { %v2211_v53 = vmul.f32 %v3070_v51, %v2193_v41 }
 0x9ee   : > { %v2212_v54 = vpack.c.bf16 %v2211_v53, %v2210_v52 }
 0x9f0   : > { %2872 = vmatmul.mubr.bf16.vlgmr.msra.gmra.mrb[0].mxu1 %v2212_v54 }
 0xac2   : > { %2329 = sbr.rel (%p2664_p5) target bundleno = 2769 (0xad1), region = 125 }
 0xac3   : > { %v2311_v56 = vpop.f32.mrb[0].mxu1 }
 0xac4   : > { %v2322_v58 = vadd.f32 %v2320_v55, %v2311_v56  ;;  %v2873_v60 = vpop.f32.mrb[1].mxu1 }
 0xac5   : > { %v2314_v61 = vpop.f32.mrb[2].mxu1 }
 0xac6   : > { %2324 = vst.msk [vmem:[%s2319_s13] sm:$0xff] %vm2151_vm11, %v2322_v58  ;;  %v2323_v11 = vadd.f32 %v2321_v57, %v2314_v61  ;;  %v2874_v62 = vpop.f32.mrb[3].mxu1 }
 0xac8   : > { %2325 = vst.msk [vmem:[%s2319_s13 + $0x8] sm:$0xff] %vm2151_vm11, %v2323_v11 }
 0xacd   : > { %v2330_v63 = vld [vmem:[%s2319_s13] sm:$0xff] }
 0xace   : > { %2332 = vst.msk [vmem:[%s3516_s12] sm:$0xff] %vm2151_vm11, %v2330_v63 }
 0xacf   : > { %v2331_v0 = vld [vmem:[%s2319_s13 + $0x8] sm:$0xff] }
 0xad0   : > { %2333 = vst.msk [vmem:[%s3516_s12 + $0x8] sm:$0xff] %vm2151_vm11, %v2331_v0 }
 0xad1 PF: > { %s3986_s20 = sld [smem:[#allocation17_spill]]  ;;  %s4018_s24 = smov (!%p3394_p1, %s3195_s24), 0 }
 0xad2   : > { %s2875_s18 = scalar_select %p3394_p1, [#allocation9], [#allocation13] }
 0xad3   : > { %s2351_s10 = sshll.u32 %s3516_s12, 4  ;;  %s2666_s26 = sshll.u32 %s3191_s23, 1  ;;  %s3818_s10 = int_to_ptr.vmem [resolvable:$true] %s2351_s10 }
 0xad4   : > { %s2342_s22 = sld [smem:[%s2875_s18 + %s4018_s24]]  ;;  %s3083_s0 = scalar_lea.vmem %s3818_s10, 256 }
 0xad5   : > { %s3987_s9 = sld [smem:[#allocation47_spill]]  ;;  %p3084_p6 = scmp.ne.s32.totalorder %s3818_s10, %s3083_s0 }
 0xad6   : > { %s3226_s23 = smov [#allocation11]  }
 0xad7   : > { %s3988_s5 = sand.u32 1, %s3986_s20   ;;  %p3085_p7 = pnand %p3084_p6, %p3394_p1 }
 0xad8   : > { %s3827_s3 = scalar_lea.sflag [#allocation12], %s3988_s5  ;;  %s3087_s24 = sshll.u32 %s3226_s23, 4  ;;  %s3088_s24 = int_to_ptr.vmem [resolvable:$false] %s3087_s24 }
 0xad9   : > { %p3086_p8 = pneg %p3085_p7  ;;  %s3089_s12 = scalar_lea.vmem %s3088_s24, 512 }
 0xada   : > { %s2667_s11 = sshll.u32 %s2342_s22, 2  ;;  %p3090_p9 = scmp.lt.s32.totalorder %s3818_s10, %s3088_s24 }
 0xadb   : > { %s2348_s27 = sadd.s32 %s2667_s11, %s2666_s26  ;;  %p3091_p10 = scmp.lt.s32.totalorder %s3089_s12, %s3083_s0 }
 0xadc   : > { %s2668_s8 = sshll.u32 %s2348_s27, 7 }
 0xadd   : > { %s3823_s16 = scalar_lea.hbm %s3987_s9, %s2668_s8  ;;  %p3092_p11 = por %p3091_p10, %p3090_p9 }
 0xadf   : > { %p3093_p12 = pnand %p3092_p11, %p3086_p8 }
 0xae1   : > { %3096 = shalt.err (!%p3093_p12)
}
 0xae2   : > { %s3097_s17 = scalar_lea.hbm %s3823_s16, 256  ;;  %s3101_s28 = scalar_lea.hbm %s3987_s9, 1024 }
 0xae3   : > { %p3098_p13 = scmp.ne.s32.totalorder %s3823_s16, %s3097_s17  ;;  %p3102_p4 = scmp.lt.u32.totalorder %s3823_s16, %s3987_s9 }
 0xae4   : > { %p3103_p5 = scmp.lt.u32.totalorder %s3101_s28, %s3097_s17  ;;  %p3105_p7 = scmp.lt.u32.totalorder %s3097_s17, %s3823_s16 }
 0xae5   : > { %p3099_p0 = pnand %p3098_p13, %p3394_p1 }
 0xae6   : > { %p3104_p6 = por %p3103_p5, %p3102_p4 }
 0xae7   : > { %p3100_p3 = pneg %p3099_p0 }
 0xae8   : > { %p3106_p8 = por %p3105_p7, %p3104_p6 }
 0xaea   : > { %p3107_p9 = pnand %p3106_p8, %p3100_p3 }
 0xaec   : > { %3110 = shalt.err (!%p3107_p9)
}
 0xaed   : > { %s3227_s25 = smov 128   ;;  %s3228_s14 = smov 8  }
 0xaee   : > { %2877 = dma.vmem_to_hbm [thread:$0]  (%p3394_p1), %s3818_s10, 256, %s3823_s16, %s3827_s3, %s3227_s25, %s3227_s25, %s3228_s14  }
 0xaef PF: > { %s3989_s4 = sld [smem:[#allocation23_spill]]  ;;  %s3990_s6 = sld [smem:[#allocation16_spill]] }
 0xaf5   : > { %p2883_p10 = scmp.ge.s32.totalorder %s3989_s4, 2  ;;  %s2366_s13 = sand.u32 1, %s3990_s6  }
 0xaf6   : > { %s2367_s20 = scalar_lea.sflag [#allocation12], %s2366_s13 }
 0xaf7   : > { %p2880_p11 = pnand %p2883_p10, %p3398_p2 }
 0xaf9   : > { %3162 = dma.done.wait (!%p2880_p11), %s2367_s20, 256  }
 0xafa   : > { %3164 = vsyncadd (!%p2880_p11), %s2367_s20, 4294967040  ;;  %s33_s28 = sadd.s32 1, %s3989_s4   ;;  %s3992_s18 = sld [smem:[#allocation17_spill]] }
 0xafb   : > { %p30_p12 = scmp.ge.s32.totalorder %s33_s28, 22   ;;  %s3993_s19 = sld [smem:[#allocation18_spill]] }
 0xafc   : > { %s3994_s0 = sld [smem:[#allocation30_spill]]  ;;  %s3996_s21 = sld [smem:[#allocation29_spill]] }
 0xafd   : > { %s3995_s20 = sld [smem:[#allocation19_spill]]  ;;  %s3997_s22 = sld [smem:[#allocation20_spill]] }
 0xafe   : > { %s3998_s23 = sld [smem:[#allocation21_spill]]  ;;  %s3999_s24 = sld [smem:[#allocation22_spill]] }
 0xaff   : > { %s4000_s25 = sld [smem:[#allocation24_spill]]  ;;  %s4001_s26 = sld [smem:[#allocation25_spill]] }
 0xb00   : > { %s4002_s27 = sld [smem:[#allocation26_spill]]  ;;  %32 = sbr.rel (!%p30_p12) target bundleno = 28 (0x1c), region = 213 }
 0xb07   :  { %2372 = vsyncpa [#allocation12], 1 }
 0xb08   :  { %2374 = vsyncpa [#allocation12 + $0x1], 1 }

</bundles_post_ra>
